<compile_context>
chip_gen: v7x
topology: tpu7x:2x2x1
jax: 0.10.0
libtpu: 0.0.40
codegen_flags: <defaults>
</compile_context>

<pallas_src>
from functools import partial

import jax
import jax.numpy as jnp
from jax.experimental import pallas as pl
from jax.experimental.pallas import tpu as pltpu

CPAD = 128      # every channel dimension is zero-padded to one full lane group
MARGIN = 8      # sublane-aligned zero margin used for conv "same" padding

# (C_out, K, stride, pad) for the five Conv1d layers of the PyTorch module.
CONV_CFG = (
    (16, 64, 16, 1),
    (32, 3, 1, 1),
    (64, 2, 1, 1),
    (64, 3, 1, 1),
    (64, 3, 1, 0),
)


def _round8(n):
    return ((n + 7) // 8) * 8


def _const_map(ndim):
    zeros = (0,) * ndim
    return lambda n: zeros


# ----------------------------- fused Pallas kernel ---------------------------

def _make_fused_kernel(layer_cfg, l1_out, class_num):
    """layer_cfg: ((K, pad, L_in, L_out) for conv layers 2..5), static ints."""

    def kernel(p_ref, w1_ref, b1_ref, w2_ref, b2_ref, w3_ref, b3_ref,
               w4_ref, b4_ref, w5_ref, b5_ref, fcw_ref, fcb_ref,
               clsw_ref, clsb_ref, out_ref, yb_ref, ab_ref):

        def conv_relu(patches, w_ref, b_ref):
            y = jnp.dot(patches.astype(jnp.bfloat16), w_ref[...],
                        preferred_element_type=jnp.float32)
            return jnp.maximum(y + b_ref[...], 0.0)

        def maxpool2(l_out):
            lp = l_out // 2                          # PyTorch floor behaviour
            return jnp.maximum(yb_ref[pl.ds(0, lp, 2), :],
                               yb_ref[pl.ds(1, lp, 2), :])

        # ---- conv1 + ReLU (patches built by wrapper) + MaxPool(2,2) ----
        yb_ref[pl.ds(0, l1_out), :] = conv_relu(p_ref[...], w1_ref, b1_ref)
        pooled = maxpool2(l1_out)

        # ---- conv2..conv5, each + ReLU + MaxPool(2,2), all in VMEM ----
        conv_refs = ((w2_ref, b2_ref), (w3_ref, b3_ref),
                     (w4_ref, b4_ref), (w5_ref, b5_ref))
        for (w_ref, b_ref), (K, pad, L_in, L_out) in zip(conv_refs, layer_cfg):
            # stage previous pooled activation inside a zero margin
            ab_ref[...] = jnp.zeros_like(ab_ref)
            ab_ref[pl.ds(MARGIN, L_in), :] = pooled
            # in-VMEM im2col: K shifted slices of the margined activation
            patches = jnp.concatenate(
                [ab_ref[pl.ds(MARGIN - pad + k, L_out), :] for k in range(K)],
                axis=-1)
            yb_ref[pl.ds(0, L_out), :] = conv_relu(patches, w_ref, b_ref)
            pooled = maxpool2(L_out)

        # ---- fc: Linear(64,100) + Sigmoid (fp32 elementwise, EUP recip) ----
        h = jnp.dot(pooled.astype(jnp.bfloat16), fcw_ref[...],
                    preferred_element_type=jnp.float32) + fcb_ref[...]
        h = pl.reciprocal(1.0 + jnp.exp(-h), approx=True)

        # ---- classifier: Linear(100,class_num) + LogSoftmax(dim=1) ----
        logits = jnp.dot(h.astype(jnp.bfloat16), clsw_ref[...],
                         preferred_element_type=jnp.float32) + clsb_ref[...]
        lane = jax.lax.broadcasted_iota(jnp.int32, logits.shape, 1)
        masked = jnp.where(lane < class_num, logits, -jnp.inf)
        m = jnp.max(masked, axis=-1, keepdims=True)
        z = masked - m
        lse = jnp.log(jnp.sum(jnp.exp(z), axis=-1, keepdims=True))
        out_ref[...] = z - lse                       # padded lanes hold -inf

    return kernel


# ------------------------------ forward wrapper -------------------------------

@partial(jax.jit, static_argnames=("class_num",))
def siamese_net_forward(kparams, x_ncl, *, class_num):
    """x_ncl: (N, C_in, L) PyTorch layout -> (N, class_num) log-probs."""
    N, C_in, L = x_ncl.shape
    x = jnp.transpose(x_ncl, (0, 2, 1)).astype(jnp.float32)       # NCL -> NLC

    # ---------- static geometry (python ints at trace time) ----------
    _, K1, S1, P1 = CONV_CFG[0]
    assert K1 % S1 == 0, "conv1 im2col uses K1 % stride == 0"
    L1 = (L + 2 * P1 - K1) // S1 + 1
    G = K1 // S1
    L_need = S1 * (L1 - 1) + K1

    layer_cfg = []
    L_cur = L1 // 2
    for _, k, s, p in CONV_CFG[1:]:
        assert s == 1
        L_out = (L_cur + 2 * p - k) // s + 1
        layer_cfg.append((k, p, L_cur, L_out))
        L_cur = L_out // 2
    assert L_cur == 1, "flatten must yield 64 features (e.g. L = 1024)"
    layer_cfg = tuple(layer_cfg)

    yb_rows = _round8(max([L1] + [c[3] for c in layer_cfg]))
    ab_rows = _round8(MARGIN + max(c[2] for c in layer_cfg) + 1)

    # ------- conv1 im2col: G shifted contiguous views (no gather) -------
    x_p = jnp.pad(x, ((0, 0), (P1, P1), (0, 0)))[:, :L_need, :]
    xb = x_p.reshape(N, L_need // S1, S1 * C_in)
    patches = jnp.concatenate([xb[:, g:g + L1, :] for g in range(G)], axis=-1)
    patches = patches.astype(jnp.bfloat16)                        # (N, L1, K1*C_in)

    weights = [kparams[name] for name in (
        "w1", "b1", "w2", "b2", "w3", "b3", "w4", "b4", "w5", "b5",
        "fc_w", "fc_b", "cls_w", "cls_b")]

    in_specs = [pl.BlockSpec((None, L1, K1 * C_in), lambda n: (n, 0, 0))]
    in_specs += [pl.BlockSpec(w.shape, _const_map(w.ndim)) for w in weights]

    out = pl.pallas_call(
        _make_fused_kernel(layer_cfg, L1, class_num),
        out_shape=jax.ShapeDtypeStruct((N, 1, CPAD), jnp.float32),
        grid=(N,),
        in_specs=in_specs,
        out_specs=pl.BlockSpec((None, 1, CPAD), lambda n: (n, 0, 0)),
        scratch_shapes=[pltpu.VMEM((yb_rows, CPAD), jnp.float32),
                        pltpu.VMEM((ab_rows, CPAD), jnp.float32)],
        compiler_params=pltpu.CompilerParams(
            dimension_semantics=("parallel",)),    # v7x: batch over both TCs
    )(patches, *weights)
    return out[:, 0, :class_num]


# ------------------------------ parameters ------------------------------------

def init_params(key, C_in, class_num):
    """Synthetic raw parameters matching the PyTorch module's shapes."""
    assert class_num <= CPAD
    keys = jax.random.split(key, 2 * len(CONV_CFG) + 4)
    ki = 0
    raw = {"convs": []}
    chans = C_in
    for co, k, _, _ in CONV_CFG:
        fan_in = chans * k
        w = jax.random.normal(keys[ki], (co, chans, k), jnp.float32) / jnp.sqrt(fan_in)
        ki += 1
        b = jax.random.normal(keys[ki], (co,), jnp.float32) * 0.01
        ki += 1
        raw["convs"].append((w, b))
        chans = co
    raw["fc_w"] = jax.random.normal(keys[ki], (64, 100), jnp.float32) / 8.0; ki += 1
    raw["fc_b"] = jax.random.normal(keys[ki], (100,), jnp.float32) * 0.01; ki += 1
    raw["cls_w"] = jax.random.normal(keys[ki], (100, class_num), jnp.float32) / 10.0; ki += 1
    raw["cls_b"] = jax.random.normal(keys[ki], (class_num,), jnp.float32) * 0.01; ki += 1
    return raw


def pack_params(raw, C_in):
    """Pre-pack weights ONCE: im2col layout, zero-pad to 128 lanes, bf16 ops."""
    def pad_bias(b):
        return jnp.pad(b, (0, CPAD - b.shape[0])).reshape(1, CPAD).astype(jnp.float32)

    kp = {}
    # conv1: patch feature order is (k, c_in_real)  ->  rows = K1*C_in
    w1, b1 = raw["convs"][0]
    co1, _, k1 = w1.shape
    W1 = jnp.transpose(w1, (2, 1, 0)).reshape(k1 * C_in, co1)
    kp["w1"] = jnp.pad(W1, ((0, 0), (0, CPAD - co1))).astype(jnp.bfloat16)
    kp["b1"] = pad_bias(b1)
    # conv2..5: patch feature order is (k, c_in_padded) -> rows = K*CPAD
    for i, (w, b) in enumerate(raw["convs"][1:], start=2):
        co, ci, k = w.shape
        Wt = jnp.transpose(w, (2, 1, 0))                       # (K, C_in, C_out)
        Wt = jnp.pad(Wt, ((0, 0), (0, CPAD - ci), (0, CPAD - co)))
        kp[f"w{i}"] = Wt.reshape(k * CPAD, CPAD).astype(jnp.bfloat16)
        kp[f"b{i}"] = pad_bias(b)
    fw, fb = raw["fc_w"], raw["fc_b"]
    kp["fc_w"] = jnp.pad(fw, ((0, CPAD - fw.shape[0]),
                              (0, CPAD - fw.shape[1]))).astype(jnp.bfloat16)
    kp["fc_b"] = pad_bias(fb)
    cw, cb = raw["cls_w"], raw["cls_b"]
    kp["cls_w"] = jnp.pad(cw, ((0, CPAD - cw.shape[0]),
                               (0, CPAD - cw.shape[1]))).astype(jnp.bfloat16)
    kp["cls_b"] = pad_bias(cb)
    return kp


# ------------------------------ fp32 reference --------------------------------

def reference_forward(raw, x_ncl, class_num):
    """Pure-JAX fp32 reference mirroring the PyTorch module semantics."""
    x = x_ncl.astype(jnp.float32)
    for (w, b), (_, _, s, p) in zip(raw["convs"], CONV_CFG):
        x = jax.lax.conv_general_dilated(
            x, w, window_strides=(s,), padding=[(p, p)],
            dimension_numbers=("NCH", "OIH", "NCH"))
        x = jnp.maximum(x + b[None, :, None], 0.0)
        lc = x.shape[2] // 2
        x = jnp.max(x[:, :, :2 * lc].reshape(x.shape[0], x.shape[1], lc, 2), axis=-1)
    flat = x.reshape(x.shape[0], -1)
    h = jax.nn.sigmoid(flat @ raw["fc_w"] + raw["fc_b"])
    logits = h @ raw["cls_w"] + raw["cls_b"]
    return jax.nn.log_softmax(logits, axis=-1)


# ------------------------------------ main -------------------------------------

if __name__ == "__main__":
    C_in, class_num, N, L = 2, 10, 2, 1024   # L=1024 -> flatten yields 64 features

    key = jax.random.PRNGKey(0)
    k_param, k_x = jax.random.split(key)
    raw = init_params(k_param, C_in, class_num)
    kparams = pack_params(raw, C_in)
    x = jax.random.normal(k_x, (N, C_in, L), jnp.float32)     # PyTorch NCL input

    out = siamese_net_forward(kparams, x, class_num=class_num)
    out = jax.block_until_ready(out)

    assert out.shape == (N, class_num), out.shape
    # log-softmax sanity: rows exponentiate-sum to ~1
    assert bool(jnp.allclose(jnp.sum(jnp.exp(out), axis=1), 1.0, atol=1e-3))
    # matches a pure-JAX fp32 reference (bf16 matmul operands -> loose tol)
    ref = reference_forward(raw, x, class_num)
    assert bool(jnp.allclose(out, ref, atol=1e-1)), float(jnp.max(jnp.abs(out - ref)))
    print("KERNEL_OK")
</pallas_src>

<mosaic_0001>
module attributes {stable_mosaic.version = 11 : i64} {
  func.func @kernel(%arg0: i32, %arg1: memref<1x61x128xbf16, #tpu.memory_space<vmem>>, %arg2: memref<128x128xbf16, #tpu.memory_space<vmem>>, %arg3: memref<1x128xf32, #tpu.memory_space<vmem>>, %arg4: memref<384x128xbf16, #tpu.memory_space<vmem>>, %arg5: memref<1x128xf32, #tpu.memory_space<vmem>>, %arg6: memref<256x128xbf16, #tpu.memory_space<vmem>>, %arg7: memref<1x128xf32, #tpu.memory_space<vmem>>, %arg8: memref<384x128xbf16, #tpu.memory_space<vmem>>, %arg9: memref<1x128xf32, #tpu.memory_space<vmem>>, %arg10: memref<384x128xbf16, #tpu.memory_space<vmem>>, %arg11: memref<1x128xf32, #tpu.memory_space<vmem>>, %arg12: memref<128x128xbf16, #tpu.memory_space<vmem>>, %arg13: memref<1x128xf32, #tpu.memory_space<vmem>>, %arg14: memref<128x128xbf16, #tpu.memory_space<vmem>>, %arg15: memref<1x128xf32, #tpu.memory_space<vmem>>, %arg16: memref<1x1x128xf32, #tpu.memory_space<vmem>>, %arg17: memref<64x128xf32, #tpu.memory_space<vmem>>, %arg18: memref<40x128xf32, #tpu.memory_space<vmem>>) attributes {dimension_semantics = [#tpu.dimension_semantics<parallel>], iteration_bounds = array<i64: 2>, scalar_prefetch = 0 : i64, scratch_operands = 2 : i64, tpu.core_type = #tpu.core_type<tc>, window_params = [{transform_indices = @transform_0, window_bounds = array<i64: 1, 61, 128>}, {pipeline_mode = #tpu.pipeline_mode<synchronous>, transform_indices = @transform_1, window_bounds = array<i64: 128, 128>}, {pipeline_mode = #tpu.pipeline_mode<synchronous>, transform_indices = @transform_2, window_bounds = array<i64: 1, 128>}, {pipeline_mode = #tpu.pipeline_mode<synchronous>, transform_indices = @transform_3, window_bounds = array<i64: 384, 128>}, {pipeline_mode = #tpu.pipeline_mode<synchronous>, transform_indices = @transform_4, window_bounds = array<i64: 1, 128>}, {pipeline_mode = #tpu.pipeline_mode<synchronous>, transform_indices = @transform_5, window_bounds = array<i64: 256, 128>}, {pipeline_mode = #tpu.pipeline_mode<synchronous>, transform_indices = @transform_6, window_bounds = array<i64: 1, 128>}, {pipeline_mode = #tpu.pipeline_mode<synchronous>, transform_indices = @transform_7, window_bounds = array<i64: 384, 128>}, {pipeline_mode = #tpu.pipeline_mode<synchronous>, transform_indices = @transform_8, window_bounds = array<i64: 1, 128>}, {pipeline_mode = #tpu.pipeline_mode<synchronous>, transform_indices = @transform_9, window_bounds = array<i64: 384, 128>}, {pipeline_mode = #tpu.pipeline_mode<synchronous>, transform_indices = @transform_10, window_bounds = array<i64: 1, 128>}, {pipeline_mode = #tpu.pipeline_mode<synchronous>, transform_indices = @transform_11, window_bounds = array<i64: 128, 128>}, {pipeline_mode = #tpu.pipeline_mode<synchronous>, transform_indices = @transform_12, window_bounds = array<i64: 1, 128>}, {pipeline_mode = #tpu.pipeline_mode<synchronous>, transform_indices = @transform_13, window_bounds = array<i64: 128, 128>}, {pipeline_mode = #tpu.pipeline_mode<synchronous>, transform_indices = @transform_14, window_bounds = array<i64: 1, 128>}, {transform_indices = @transform_15, window_bounds = array<i64: 1, 1, 128>}]} {
    %c0 = arith.constant 0 : index
    %c0_0 = arith.constant 0 : index
    %c0_1 = arith.constant 0 : index
    %0 = vector.load %arg1[%c0, %c0_0, %c0_1] : memref<1x61x128xbf16, #tpu.memory_space<vmem>>, vector<1x61x128xbf16>
    %1 = vector.shape_cast %0 : vector<1x61x128xbf16> to vector<61x128xbf16>
    %c0_2 = arith.constant 0 : index
    %c0_3 = arith.constant 0 : index
    %2 = vector.load %arg2[%c0_2, %c0_3] : memref<128x128xbf16, #tpu.memory_space<vmem>>, vector<128x128xbf16>
    %cst = arith.constant dense<0.000000e+00> : vector<61x128xf32>
    %3 = tpu.matmul %1, %2, %cst {dimension_numbers = #tpu.dot_dimension_numbers<[1], [0], [0], [1], [0, 0, 1, 1], [], []>} : vector<61x128xbf16>, vector<128x128xbf16>, vector<61x128xf32> -> vector<61x128xf32>
    %c0_4 = arith.constant 0 : index
    %c0_5 = arith.constant 0 : index
    %4 = vector.load %arg3[%c0_4, %c0_5] : memref<1x128xf32, #tpu.memory_space<vmem>>, vector<1x128xf32>
    %5 = vector.broadcast %4 : vector<1x128xf32> to vector<61x128xf32>
    %6 = arith.addf %3, %5 : vector<61x128xf32>
    %cst_6 = arith.constant 0.000000e+00 : f32
    %7 = vector.broadcast %cst_6 : f32 to vector<61x128xf32>
    %8 = arith.maximumf %6, %7 : vector<61x128xf32>
    %c0_7 = arith.constant 0 : index
    %c0_8 = arith.constant 0 : index
    %9 = vector.load %arg17[%c0_7, %c0_8] : memref<64x128xf32, #tpu.memory_space<vmem>>, vector<61x128xf32>
    tpu.vector_store %arg17[%c0_7, %c0_8], %8 {strides = array<i32>} : memref<64x128xf32, #tpu.memory_space<vmem>>, vector<61x128xf32>,
    %c0_9 = arith.constant 0 : index
    %c0_10 = arith.constant 0 : index
    %10 = tpu.strided_load %arg17[%c0_9, %c0_10] {strides = array<i32: 2, 1>} : memref<64x128xf32, #tpu.memory_space<vmem>>, vector<30x128xf32>
    %c1 = arith.constant 1 : index
    %c0_11 = arith.constant 0 : index
    %11 = tpu.strided_load %arg17[%c1, %c0_11] {strides = array<i32: 2, 1>} : memref<64x128xf32, #tpu.memory_space<vmem>>, vector<30x128xf32>
    %12 = arith.maximumf %10, %11 : vector<30x128xf32>
    %cst_12 = arith.constant 0.000000e+00 : f32
    %13 = vector.broadcast %cst_12 : f32 to vector<40x128xf32>
    %c0_13 = arith.constant 0 : index
    %c0_14 = arith.constant 0 : index
    %14 = vector.load %arg18[%c0_13, %c0_14] : memref<40x128xf32, #tpu.memory_space<vmem>>, vector<40x128xf32>
    tpu.vector_store %arg18[%c0_13, %c0_14], %13 {strides = array<i32>} : memref<40x128xf32, #tpu.memory_space<vmem>>, vector<40x128xf32>,
    %c8 = arith.constant 8 : index
    %c0_15 = arith.constant 0 : index
    %15 = vector.load %arg18[%c8, %c0_15] : memref<40x128xf32, #tpu.memory_space<vmem>>, vector<30x128xf32>
    tpu.vector_store %arg18[%c8, %c0_15], %12 {strides = array<i32>} : memref<40x128xf32, #tpu.memory_space<vmem>>, vector<30x128xf32>,
    %c7 = arith.constant 7 : index
    %c0_16 = arith.constant 0 : index
    %16 = vector.load %arg18[%c7, %c0_16] : memref<40x128xf32, #tpu.memory_space<vmem>>, vector<30x128xf32>
    %c8_17 = arith.constant 8 : index
    %c0_18 = arith.constant 0 : index
    %17 = vector.load %arg18[%c8_17, %c0_18] : memref<40x128xf32, #tpu.memory_space<vmem>>, vector<30x128xf32>
    %c9 = arith.constant 9 : index
    %c0_19 = arith.constant 0 : index
    %18 = vector.load %arg18[%c9, %c0_19] : memref<40x128xf32, #tpu.memory_space<vmem>>, vector<30x128xf32>
    %19 = tpu.concatenate %16, %17, %18 in 1 : vector<30x128xf32>, vector<30x128xf32>, vector<30x128xf32> -> vector<30x384xf32>
    %20 = arith.truncf %19 : vector<30x384xf32> to vector<30x384xbf16>
    %c0_20 = arith.constant 0 : index
    %c0_21 = arith.constant 0 : index
    %21 = vector.load %arg4[%c0_20, %c0_21] : memref<384x128xbf16, #tpu.memory_space<vmem>>, vector<384x128xbf16>
    %cst_22 = arith.constant dense<0.000000e+00> : vector<30x128xf32>
    %22 = tpu.matmul %20, %21, %cst_22 {dimension_numbers = #tpu.dot_dimension_numbers<[1], [0], [0], [1], [0, 0, 1, 1], [], []>} : vector<30x384xbf16>, vector<384x128xbf16>, vector<30x128xf32> -> vector<30x128xf32>
    %c0_23 = arith.constant 0 : index
    %c0_24 = arith.constant 0 : index
    %23 = vector.load %arg5[%c0_23, %c0_24] : memref<1x128xf32, #tpu.memory_space<vmem>>, vector<1x128xf32>
    %24 = vector.broadcast %23 : vector<1x128xf32> to vector<30x128xf32>
    %25 = arith.addf %22, %24 : vector<30x128xf32>
    %cst_25 = arith.constant 0.000000e+00 : f32
    %26 = vector.broadcast %cst_25 : f32 to vector<30x128xf32>
    %27 = arith.maximumf %25, %26 : vector<30x128xf32>
    %c0_26 = arith.constant 0 : index
    %c0_27 = arith.constant 0 : index
    %28 = vector.load %arg17[%c0_26, %c0_27] : memref<64x128xf32, #tpu.memory_space<vmem>>, vector<30x128xf32>
    tpu.vector_store %arg17[%c0_26, %c0_27], %27 {strides = array<i32>} : memref<64x128xf32, #tpu.memory_space<vmem>>, vector<30x128xf32>,
    %c0_28 = arith.constant 0 : index
    %c0_29 = arith.constant 0 : index
    %29 = tpu.strided_load %arg17[%c0_28, %c0_29] {strides = array<i32: 2, 1>} : memref<64x128xf32, #tpu.memory_space<vmem>>, vector<15x128xf32>
    %c1_30 = arith.constant 1 : index
    %c0_31 = arith.constant 0 : index
    %30 = tpu.strided_load %arg17[%c1_30, %c0_31] {strides = array<i32: 2, 1>} : memref<64x128xf32, #tpu.memory_space<vmem>>, vector<15x128xf32>
    %31 = arith.maximumf %29, %30 : vector<15x128xf32>
    %cst_32 = arith.constant 0.000000e+00 : f32
    %32 = vector.broadcast %cst_32 : f32 to vector<40x128xf32>
    %c0_33 = arith.constant 0 : index
    %c0_34 = arith.constant 0 : index
    %33 = vector.load %arg18[%c0_33, %c0_34] : memref<40x128xf32, #tpu.memory_space<vmem>>, vector<40x128xf32>
    tpu.vector_store %arg18[%c0_33, %c0_34], %32 {strides = array<i32>} : memref<40x128xf32, #tpu.memory_space<vmem>>, vector<40x128xf32>,
    %c8_35 = arith.constant 8 : index
    %c0_36 = arith.constant 0 : index
    %34 = vector.load %arg18[%c8_35, %c0_36] : memref<40x128xf32, #tpu.memory_space<vmem>>, vector<15x128xf32>
    tpu.vector_store %arg18[%c8_35, %c0_36], %31 {strides = array<i32>} : memref<40x128xf32, #tpu.memory_space<vmem>>, vector<15x128xf32>,
    %c7_37 = arith.constant 7 : index
    %c0_38 = arith.constant 0 : index
    %35 = vector.load %arg18[%c7_37, %c0_38] : memref<40x128xf32, #tpu.memory_space<vmem>>, vector<16x128xf32>
    %c8_39 = arith.constant 8 : index
    %c0_40 = arith.constant 0 : index
    %36 = vector.load %arg18[%c8_39, %c0_40] : memref<40x128xf32, #tpu.memory_space<vmem>>, vector<16x128xf32>
    %37 = tpu.concatenate %35, %36 in 1 : vector<16x128xf32>, vector<16x128xf32> -> vector<16x256xf32>
    %38 = arith.truncf %37 : vector<16x256xf32> to vector<16x256xbf16>
    %c0_41 = arith.constant 0 : index
    %c0_42 = arith.constant 0 : index
    %39 = vector.load %arg6[%c0_41, %c0_42] : memref<256x128xbf16, #tpu.memory_space<vmem>>, vector<256x128xbf16>
    %cst_43 = arith.constant dense<0.000000e+00> : vector<16x128xf32>
    %40 = tpu.matmul %38, %39, %cst_43 {dimension_numbers = #tpu.dot_dimension_numbers<[1], [0], [0], [1], [0, 0, 1, 1], [], []>} : vector<16x256xbf16>, vector<256x128xbf16>, vector<16x128xf32> -> vector<16x128xf32>
    %c0_44 = arith.constant 0 : index
    %c0_45 = arith.constant 0 : index
    %41 = vector.load %arg7[%c0_44, %c0_45] : memref<1x128xf32, #tpu.memory_space<vmem>>, vector<1x128xf32>
    %42 = vector.broadcast %41 : vector<1x128xf32> to vector<16x128xf32>
    %43 = arith.addf %40, %42 : vector<16x128xf32>
    %cst_46 = arith.constant 0.000000e+00 : f32
    %44 = vector.broadcast %cst_46 : f32 to vector<16x128xf32>
    %45 = arith.maximumf %43, %44 : vector<16x128xf32>
    %c0_47 = arith.constant 0 : index
    %c0_48 = arith.constant 0 : index
    %46 = vector.load %arg17[%c0_47, %c0_48] : memref<64x128xf32, #tpu.memory_space<vmem>>, vector<16x128xf32>
    tpu.vector_store %arg17[%c0_47, %c0_48], %45 {strides = array<i32>} : memref<64x128xf32, #tpu.memory_space<vmem>>, vector<16x128xf32>,
    %c0_49 = arith.constant 0 : index
    %c0_50 = arith.constant 0 : index
    %47 = tpu.strided_load %arg17[%c0_49, %c0_50] {strides = array<i32: 2, 1>} : memref<64x128xf32, #tpu.memory_space<vmem>>, vector<8x128xf32>
    %c1_51 = arith.constant 1 : index
    %c0_52 = arith.constant 0 : index
    %48 = tpu.strided_load %arg17[%c1_51, %c0_52] {strides = array<i32: 2, 1>} : memref<64x128xf32, #tpu.memory_space<vmem>>, vector<8x128xf32>
    %49 = arith.maximumf %47, %48 : vector<8x128xf32>
    %cst_53 = arith.constant 0.000000e+00 : f32
    %50 = vector.broadcast %cst_53 : f32 to vector<40x128xf32>
    %c0_54 = arith.constant 0 : index
    %c0_55 = arith.constant 0 : index
    %51 = vector.load %arg18[%c0_54, %c0_55] : memref<40x128xf32, #tpu.memory_space<vmem>>, vector<40x128xf32>
    tpu.vector_store %arg18[%c0_54, %c0_55], %50 {strides = array<i32>} : memref<40x128xf32, #tpu.memory_space<vmem>>, vector<40x128xf32>,
    %c8_56 = arith.constant 8 : index
    %c0_57 = arith.constant 0 : index
    %52 = vector.load %arg18[%c8_56, %c0_57] : memref<40x128xf32, #tpu.memory_space<vmem>>, vector<8x128xf32>
    tpu.vector_store %arg18[%c8_56, %c0_57], %49 {strides = array<i32>} : memref<40x128xf32, #tpu.memory_space<vmem>>, vector<8x128xf32>,
    %c7_58 = arith.constant 7 : index
    %c0_59 = arith.constant 0 : index
    %53 = vector.load %arg18[%c7_58, %c0_59] : memref<40x128xf32, #tpu.memory_space<vmem>>, vector<8x128xf32>
    %c8_60 = arith.constant 8 : index
    %c0_61 = arith.constant 0 : index
    %54 = vector.load %arg18[%c8_60, %c0_61] : memref<40x128xf32, #tpu.memory_space<vmem>>, vector<8x128xf32>
    %c9_62 = arith.constant 9 : index
    %c0_63 = arith.constant 0 : index
    %55 = vector.load %arg18[%c9_62, %c0_63] : memref<40x128xf32, #tpu.memory_space<vmem>>, vector<8x128xf32>
    %56 = tpu.concatenate %53, %54, %55 in 1 : vector<8x128xf32>, vector<8x128xf32>, vector<8x128xf32> -> vector<8x384xf32>
    %57 = arith.truncf %56 : vector<8x384xf32> to vector<8x384xbf16>
    %c0_64 = arith.constant 0 : index
    %c0_65 = arith.constant 0 : index
    %58 = vector.load %arg8[%c0_64, %c0_65] : memref<384x128xbf16, #tpu.memory_space<vmem>>, vector<384x128xbf16>
    %cst_66 = arith.constant dense<0.000000e+00> : vector<8x128xf32>
    %59 = tpu.matmul %57, %58, %cst_66 {dimension_numbers = #tpu.dot_dimension_numbers<[1], [0], [0], [1], [0, 0, 1, 1], [], []>} : vector<8x384xbf16>, vector<384x128xbf16>, vector<8x128xf32> -> vector<8x128xf32>
    %c0_67 = arith.constant 0 : index
    %c0_68 = arith.constant 0 : index
    %60 = vector.load %arg9[%c0_67, %c0_68] : memref<1x128xf32, #tpu.memory_space<vmem>>, vector<1x128xf32>
    %61 = vector.broadcast %60 : vector<1x128xf32> to vector<8x128xf32>
    %62 = arith.addf %59, %61 : vector<8x128xf32>
    %cst_69 = arith.constant 0.000000e+00 : f32
    %63 = vector.broadcast %cst_69 : f32 to vector<8x128xf32>
    %64 = arith.maximumf %62, %63 : vector<8x128xf32>
    %c0_70 = arith.constant 0 : index
    %c0_71 = arith.constant 0 : index
    %65 = vector.load %arg17[%c0_70, %c0_71] : memref<64x128xf32, #tpu.memory_space<vmem>>, vector<8x128xf32>
    tpu.vector_store %arg17[%c0_70, %c0_71], %64 {strides = array<i32>} : memref<64x128xf32, #tpu.memory_space<vmem>>, vector<8x128xf32>,
    %c0_72 = arith.constant 0 : index
    %c0_73 = arith.constant 0 : index
    %66 = tpu.strided_load %arg17[%c0_72, %c0_73] {strides = array<i32: 2, 1>} : memref<64x128xf32, #tpu.memory_space<vmem>>, vector<4x128xf32>
    %c1_74 = arith.constant 1 : index
    %c0_75 = arith.constant 0 : index
    %67 = tpu.strided_load %arg17[%c1_74, %c0_75] {strides = array<i32: 2, 1>} : memref<64x128xf32, #tpu.memory_space<vmem>>, vector<4x128xf32>
    %68 = arith.maximumf %66, %67 : vector<4x128xf32>
    %cst_76 = arith.constant 0.000000e+00 : f32
    %69 = vector.broadcast %cst_76 : f32 to vector<40x128xf32>
    %c0_77 = arith.constant 0 : index
    %c0_78 = arith.constant 0 : index
    %70 = vector.load %arg18[%c0_77, %c0_78] : memref<40x128xf32, #tpu.memory_space<vmem>>, vector<40x128xf32>
    tpu.vector_store %arg18[%c0_77, %c0_78], %69 {strides = array<i32>} : memref<40x128xf32, #tpu.memory_space<vmem>>, vector<40x128xf32>,
    %c8_79 = arith.constant 8 : index
    %c0_80 = arith.constant 0 : index
    %71 = vector.load %arg18[%c8_79, %c0_80] : memref<40x128xf32, #tpu.memory_space<vmem>>, vector<4x128xf32>
    tpu.vector_store %arg18[%c8_79, %c0_80], %68 {strides = array<i32>} : memref<40x128xf32, #tpu.memory_space<vmem>>, vector<4x128xf32>,
    %c8_81 = arith.constant 8 : index
    %c0_82 = arith.constant 0 : index
    %72 = vector.load %arg18[%c8_81, %c0_82] : memref<40x128xf32, #tpu.memory_space<vmem>>, vector<2x128xf32>
    %c9_83 = arith.constant 9 : index
    %c0_84 = arith.constant 0 : index
    %73 = vector.load %arg18[%c9_83, %c0_84] : memref<40x128xf32, #tpu.memory_space<vmem>>, vector<2x128xf32>
    %c10 = arith.constant 10 : index
    %c0_85 = arith.constant 0 : index
    %74 = vector.load %arg18[%c10, %c0_85] : memref<40x128xf32, #tpu.memory_space<vmem>>, vector<2x128xf32>
    %75 = tpu.concatenate %72, %73, %74 in 1 : vector<2x128xf32>, vector<2x128xf32>, vector<2x128xf32> -> vector<2x384xf32>
    %76 = arith.truncf %75 : vector<2x384xf32> to vector<2x384xbf16>
    %c0_86 = arith.constant 0 : index
    %c0_87 = arith.constant 0 : index
    %77 = vector.load %arg10[%c0_86, %c0_87] : memref<384x128xbf16, #tpu.memory_space<vmem>>, vector<384x128xbf16>
    %cst_88 = arith.constant dense<0.000000e+00> : vector<2x128xf32>
    %78 = tpu.matmul %76, %77, %cst_88 {dimension_numbers = #tpu.dot_dimension_numbers<[1], [0], [0], [1], [0, 0, 1, 1], [], []>} : vector<2x384xbf16>, vector<384x128xbf16>, vector<2x128xf32> -> vector<2x128xf32>
    %c0_89 = arith.constant 0 : index
    %c0_90 = arith.constant 0 : index
    %79 = vector.load %arg11[%c0_89, %c0_90] : memref<1x128xf32, #tpu.memory_space<vmem>>, vector<1x128xf32>
    %80 = vector.broadcast %79 : vector<1x128xf32> to vector<2x128xf32>
    %81 = arith.addf %78, %80 : vector<2x128xf32>
    %cst_91 = arith.constant 0.000000e+00 : f32
    %82 = vector.broadcast %cst_91 : f32 to vector<2x128xf32>
    %83 = arith.maximumf %81, %82 : vector<2x128xf32>
    %c0_92 = arith.constant 0 : index
    %c0_93 = arith.constant 0 : index
    %84 = vector.load %arg17[%c0_92, %c0_93] : memref<64x128xf32, #tpu.memory_space<vmem>>, vector<2x128xf32>
    tpu.vector_store %arg17[%c0_92, %c0_93], %83 {strides = array<i32>} : memref<64x128xf32, #tpu.memory_space<vmem>>, vector<2x128xf32>,
    %c0_94 = arith.constant 0 : index
    %c0_95 = arith.constant 0 : index
    %85 = tpu.strided_load %arg17[%c0_94, %c0_95] {strides = array<i32: 2, 1>} : memref<64x128xf32, #tpu.memory_space<vmem>>, vector<1x128xf32>
    %c1_96 = arith.constant 1 : index
    %c0_97 = arith.constant 0 : index
    %86 = tpu.strided_load %arg17[%c1_96, %c0_97] {strides = array<i32: 2, 1>} : memref<64x128xf32, #tpu.memory_space<vmem>>, vector<1x128xf32>
    %87 = arith.maximumf %85, %86 : vector<1x128xf32>
    %88 = arith.truncf %87 : vector<1x128xf32> to vector<1x128xbf16>
    %c0_98 = arith.constant 0 : index
    %c0_99 = arith.constant 0 : index
    %89 = vector.load %arg12[%c0_98, %c0_99] : memref<128x128xbf16, #tpu.memory_space<vmem>>, vector<128x128xbf16>
    %cst_100 = arith.constant dense<0.000000e+00> : vector<1x128xf32>
    %90 = tpu.matmul %88, %89, %cst_100 {dimension_numbers = #tpu.dot_dimension_numbers<[1], [0], [0], [1], [0, 0, 1, 1], [], []>} : vector<1x128xbf16>, vector<128x128xbf16>, vector<1x128xf32> -> vector<1x128xf32>
    %c0_101 = arith.constant 0 : index
    %c0_102 = arith.constant 0 : index
    %91 = vector.load %arg13[%c0_101, %c0_102] : memref<1x128xf32, #tpu.memory_space<vmem>>, vector<1x128xf32>
    %92 = arith.addf %90, %91 : vector<1x128xf32>
    %cst_103 = arith.constant 0.000000e+00 : f32
    %93 = vector.broadcast %cst_103 : f32 to vector<1x128xf32>
    %94 = arith.subf %93, %92 : vector<1x128xf32>
    %95 = math.exp %94 : vector<1x128xf32>
    %cst_104 = arith.constant 1.000000e+00 : f32
    %96 = vector.broadcast %cst_104 : f32 to vector<1x128xf32>
    %97 = arith.addf %96, %95 : vector<1x128xf32>
    %98 = tpu.reciprocal %97 {approx = true} : vector<1x128xf32> -> vector<1x128xf32>
    %99 = arith.truncf %98 : vector<1x128xf32> to vector<1x128xbf16>
    %c0_105 = arith.constant 0 : index
    %c0_106 = arith.constant 0 : index
    %100 = vector.load %arg14[%c0_105, %c0_106] : memref<128x128xbf16, #tpu.memory_space<vmem>>, vector<128x128xbf16>
    %cst_107 = arith.constant dense<0.000000e+00> : vector<1x128xf32>
    %101 = tpu.matmul %99, %100, %cst_107 {dimension_numbers = #tpu.dot_dimension_numbers<[1], [0], [0], [1], [0, 0, 1, 1], [], []>} : vector<1x128xbf16>, vector<128x128xbf16>, vector<1x128xf32> -> vector<1x128xf32>
    %c0_108 = arith.constant 0 : index
    %c0_109 = arith.constant 0 : index
    %102 = vector.load %arg15[%c0_108, %c0_109] : memref<1x128xf32, #tpu.memory_space<vmem>>, vector<1x128xf32>
    %103 = arith.addf %101, %102 : vector<1x128xf32>
    %104 = tpu.iota {dimensions = array<i32: 1>} : vector<1x128xi32>
    %c10_i32 = arith.constant 10 : i32
    %105 = vector.broadcast %c10_i32 : i32 to vector<1x128xi32>
    %106 = arith.cmpi slt, %104, %105 : vector<1x128xi32>
    %cst_110 = arith.constant 0xFF800000 : f32
    %107 = vector.broadcast %cst_110 : f32 to vector<1x128xf32>
    %108 = arith.select %106, %103, %107 : vector<1x128xi1>, vector<1x128xf32>
    %cst_111 = arith.constant dense<0xFF800000> : vector<1xf32>
    %109 = vector.multi_reduction <maximumf>, %108, %cst_111 [1] : vector<1x128xf32> to vector<1xf32>
    %110 = vector.shape_cast %109 : vector<1xf32> to vector<1x1xf32>
    %111 = vector.broadcast %110 : vector<1x1xf32> to vector<1x128xf32>
    %112 = arith.subf %108, %111 : vector<1x128xf32>
    %113 = math.exp %112 : vector<1x128xf32>
    %cst_112 = arith.constant dense<0.000000e+00> : vector<1xf32>
    %114 = vector.multi_reduction <add>, %113, %cst_112 [1] : vector<1x128xf32> to vector<1xf32>
    %115 = vector.shape_cast %114 : vector<1xf32> to vector<1x1xf32>
    %116 = math.log %115 : vector<1x1xf32>
    %117 = vector.broadcast %116 : vector<1x1xf32> to vector<1x128xf32>
    %118 = arith.subf %112, %117 : vector<1x128xf32>
    %c0_113 = arith.constant 0 : index
    %c0_114 = arith.constant 0 : index
    %c0_115 = arith.constant 0 : index
    %119 = vector.load %arg16[%c0_113, %c0_114, %c0_115] : memref<1x1x128xf32, #tpu.memory_space<vmem>>, vector<1x1x128xf32>
    %120 = vector.shape_cast %119 : vector<1x1x128xf32> to vector<1x128xf32>
    %121 = vector.shape_cast %118 : vector<1x128xf32> to vector<1x1x128xf32>
    tpu.vector_store %arg16[%c0_113, %c0_114, %c0_115], %121 {strides = array<i32>} : memref<1x1x128xf32, #tpu.memory_space<vmem>>, vector<1x1x128xf32>,
    return
  }
  func.func @transform_0(%arg0: i32) -> (i32, i32, i32) {
    %c0_i32 = arith.constant 0 : i32
    %c0_i32_0 = arith.constant 0 : i32
    %c0_i32_1 = arith.constant 0 : i32
    return %arg0, %c0_i32, %c0_i32_0 : i32, i32, i32
  }
  func.func @transform_1(%arg0: i32) -> (i32, i32) {
    %c0_i32 = arith.constant 0 : i32
    %c0_i32_0 = arith.constant 0 : i32
    %c0_i32_1 = arith.constant 0 : i32
    return %c0_i32, %c0_i32_0 : i32, i32
  }
  func.func @transform_2(%arg0: i32) -> (i32, i32) {
    %c0_i32 = arith.constant 0 : i32
    %c0_i32_0 = arith.constant 0 : i32
    %c0_i32_1 = arith.constant 0 : i32
    return %c0_i32, %c0_i32_0 : i32, i32
  }
  func.func @transform_3(%arg0: i32) -> (i32, i32) {
    %c0_i32 = arith.constant 0 : i32
    %c0_i32_0 = arith.constant 0 : i32
    %c0_i32_1 = arith.constant 0 : i32
    return %c0_i32, %c0_i32_0 : i32, i32
  }
  func.func @transform_4(%arg0: i32) -> (i32, i32) {
    %c0_i32 = arith.constant 0 : i32
    %c0_i32_0 = arith.constant 0 : i32
    %c0_i32_1 = arith.constant 0 : i32
    return %c0_i32, %c0_i32_0 : i32, i32
  }
  func.func @transform_5(%arg0: i32) -> (i32, i32) {
    %c0_i32 = arith.constant 0 : i32
    %c0_i32_0 = arith.constant 0 : i32
    %c0_i32_1 = arith.constant 0 : i32
    return %c0_i32, %c0_i32_0 : i32, i32
  }
  func.func @transform_6(%arg0: i32) -> (i32, i32) {
    %c0_i32 = arith.constant 0 : i32
    %c0_i32_0 = arith.constant 0 : i32
    %c0_i32_1 = arith.constant 0 : i32
    return %c0_i32, %c0_i32_0 : i32, i32
  }
  func.func @transform_7(%arg0: i32) -> (i32, i32) {
    %c0_i32 = arith.constant 0 : i32
    %c0_i32_0 = arith.constant 0 : i32
    %c0_i32_1 = arith.constant 0 : i32
    return %c0_i32, %c0_i32_0 : i32, i32
  }
  func.func @transform_8(%arg0: i32) -> (i32, i32) {
    %c0_i32 = arith.constant 0 : i32
    %c0_i32_0 = arith.constant 0 : i32
    %c0_i32_1 = arith.constant 0 : i32
    return %c0_i32, %c0_i32_0 : i32, i32
  }
  func.func @transform_9(%arg0: i32) -> (i32, i32) {
    %c0_i32 = arith.constant 0 : i32
    %c0_i32_0 = arith.constant 0 : i32
    %c0_i32_1 = arith.constant 0 : i32
    return %c0_i32, %c0_i32_0 : i32, i32
  }
  func.func @transform_10(%arg0: i32) -> (i32, i32) {
    %c0_i32 = arith.constant 0 : i32
    %c0_i32_0 = arith.constant 0 : i32
    %c0_i32_1 = arith.constant 0 : i32
    return %c0_i32, %c0_i32_0 : i32, i32
  }
  func.func @transform_11(%arg0: i32) -> (i32, i32) {
    %c0_i32 = arith.constant 0 : i32
    %c0_i32_0 = arith.constant 0 : i32
    %c0_i32_1 = arith.constant 0 : i32
    return %c0_i32, %c0_i32_0 : i32, i32
  }
  func.func @transform_12(%arg0: i32) -> (i32, i32) {
    %c0_i32 = arith.constant 0 : i32
    %c0_i32_0 = arith.constant 0 : i32
    %c0_i32_1 = arith.constant 0 : i32
    return %c0_i32, %c0_i32_0 : i32, i32
  }
  func.func @transform_13(%arg0: i32) -> (i32, i32) {
    %c0_i32 = arith.constant 0 : i32
    %c0_i32_0 = arith.constant 0 : i32
    %c0_i32_1 = arith.constant 0 : i32
    return %c0_i32, %c0_i32_0 : i32, i32
  }
  func.func @transform_14(%arg0: i32) -> (i32, i32) {
    %c0_i32 = arith.constant 0 : i32
    %c0_i32_0 = arith.constant 0 : i32
    %c0_i32_1 = arith.constant 0 : i32
    return %c0_i32, %c0_i32_0 : i32, i32
  }
  func.func @transform_15(%arg0: i32) -> (i32, i32, i32) {
    %c0_i32 = arith.constant 0 : i32
    %c0_i32_0 = arith.constant 0 : i32
    %c0_i32_1 = arith.constant 0 : i32
    return %arg0, %c0_i32, %c0_i32_0 : i32, i32, i32
  }
}

</mosaic_0001>

<bundles_post_ra>
// kernel: siamese_net_forward.1
= control target key start
LH: loop header
LB: loop body
LE: loop exit
PB: predicated region body
PF: predicated region fallthrough
CT: control target
= control target key end

     0   :  { %20 = vsyncpa [#allocation5], 0  ;;  %s3352_s0 = inlined_call_operand.vmem [shape: bf16[2,61,128], index: 0, kind: input, shape index: {}]   ;;  %s3353_s1 = inlined_call_operand.vmem [shape: bf16[128,128], index: 1, kind: input, shape index: {}]   ;;  %s3354_s2 = inlined_call_operand.vmem [shape: f32[1,128], index: 2, kind: input, shape index: {}]   ;;  %s3355_s3 = inlined_call_operand.vmem [shape: bf16[384,128], index: 3, kind: input, shape index: {}]   ;;  %s3356_s4 = inlined_call_operand.vmem [shape: f32[1,128], index: 4, kind: input, shape index: {}]   ;;  %s3357_s5 = inlined_call_operand.vmem [shape: bf16[256,128], index: 5, kind: input, shape index: {}]   ;;  %s3358_s6 = inlined_call_operand.vmem [shape: f32[1,128], index: 6, kind: input, shape index: {}]   ;;  %s3359_s7 = inlined_call_operand.vmem [shape: bf16[384,128], index: 7, kind: input, shape index: {}]   ;;  %s3360_s8 = inlined_call_operand.vmem [shape: f32[1,128], index: 8, kind: input, shape index: {}]   ;;  %s3361_s9 = inlined_call_operand.vmem [shape: bf16[384,128], index: 9, kind: input, shape index: {}]   ;;  %s3362_s10 = inlined_call_operand.vmem [shape: f32[1,128], index: 10, kind: input, shape index: {}]   ;;  %s3363_s11 = inlined_call_operand.vmem [shape: bf16[128,128], index: 11, kind: input, shape index: {}]   ;;  %s3364_s12 = inlined_call_operand.vmem [shape: f32[1,128], index: 12, kind: input, shape index: {}]   ;;  %s3365_s13 = inlined_call_operand.vmem [shape: bf16[128,128], index: 13, kind: input, shape index: {}]   ;;  %s3366_s14 = inlined_call_operand.vmem [shape: f32[1,128], index: 14, kind: input, shape index: {}]   ;;  %s3367_s15 = inlined_call_operand.hbm [shape: f32[2,1,128], index: 15, kind: output, shape index: {}]  }
   0x1   :  { %22 = vsyncpa [#allocation5 + $0x1], 0  ;;  %s2844_s18 = smov 0   ;;  %s2846_s19 = smov 0  }
   0x2   :  { %s2848_s20 = smov 0   ;;  %s2850_s21 = smov 0  }
   0x3 LB: > { %3373 = sst [smem:[#allocation7_spill]] %s2747_s18  ;;  %s2865_s22 = sadd.s32 4294967295, %s2759_s21   ;;  %s2759_s21 = sphi %s2850_s21, %s3382_s21   ;;  %s2755_s20 = sphi %s2848_s20, %s3384_s20   ;;  %s2751_s19 = sphi %s2846_s19, %s3386_s19   ;;  %s2747_s18 = sphi %s2844_s18, %s3385_s18  }
   0x4   : > { %3374 = sst [smem:[#allocation8_spill]] %s2755_s20  ;;  %s2125_s23 = sadd.s32 4294967294, %s2759_s21  }
   0x5   : > { %s2869_s24 = sadd.s32 1, %s2759_s21   ;;  %s355_s25 = sadd.s32 1, %s2755_s20 }
   0x6   : > { %3375 = sst [smem:[#allocation9_spill]] %s2869_s24  ;;  %s352_s26 = ssub.s32 %s2759_s21, %s2869_s24 }
   0x7   : > { %p365_p0 = scmp.ne.s32.totalorder %s2755_s20, %s2751_s19  ;;  %p353_p1 = scmp.eq.s32.totalorder %s352_s26, 0 }
   0x8   : > { %p366_p2 = scmp.eq.s32.totalorder %s2865_s22, 1  ;;  %p371_p3 = scmp.ne.s32.totalorder %s2751_s19, %s2747_s18 }
   0x9   : > { %p372_p4 = scmp.eq.s32.totalorder %s2125_s23, 1  ;;  %p2128_p7 = scmp.ge.s32.totalorder %s2759_s21, 1 }
   0xa   : > { %s2880_s27 = scalar_select %p353_p1, %s2755_s20, %s355_s25  }
   0xb   : > { %p2882_p5 = por %p366_p2, %p365_p0  ;;  %p2886_p6 = por %p372_p4, %p371_p3 }
   0xc   : > { %3376 = sst [smem:[#allocation10_spill]] %s2880_s27  ;;  %p440_p8 = scmp.lt.s32.totalorder %s2759_s21, 3 }
   0xd   : > { %s3378_s29 = scalar_select %p2886_p6, 1, 0 }
   0xe   : > { %p441_p9 = pnand %p2128_p7, %p440_p8 }
   0xf   : > { %3379 = sst [smem:[#allocation11_spill]] %s3378_s29  ;;  %v2573_v0 = vld [vmem:[%s3353_s1] sm:$0xff] (!%p441_p9)   ;;  %p487_p10 = scmp.lt.s32.totalorder (!%p441_p9), %s2865_s22, 1  ;;  %v2574_v1 = vld [vmem:[%s3353_s1 + $0x8] sm:$0xff] (!%p441_p9)   ;;  %v2575_v2 = vld [vmem:[%s3353_s1 + $0x10] sm:$0xff] (!%p441_p9)   ;;  %v2761_v28 = vmov (!%p441_p9), 0.0  }
  0x10   : > { %444 = sbr.rel (%p441_p9) target bundleno = 2047 (0x7ff), region = 80  ;;  %2408 = vmatprep.subr.bf16.mxu0 (!%p441_p9), %v2573_v0  ;;  %v2576_v3 = vld [vmem:[%s3353_s1 + $0x18] sm:$0xff] (!%p441_p9)   ;;  %v2577_v5 = vld [vmem:[%s3353_s1 + $0x20] sm:$0xff] (!%p441_p9)   ;;  %v2578_v8 = vld [vmem:[%s3353_s1 + $0x28] sm:$0xff] (!%p441_p9)   ;;  %700 = vst [vmem:[#allocation3 + $0x20] sm:$0xff] (!%p441_p9), %v2761_v28  ;;  %vm2762_vm0 = vmmov (!%p441_p9), 0  }
  0x11   : > { %2409 = vmatpush3.bf16.msra.mxu0 (!%p441_p9), %v2573_v0  ;;  %v2585_v6 = vld [vmem:[%s3355_s3 + $0x40] sm:$0xff] (!%p441_p9)   ;;  %v2579_v9 = vld [vmem:[%s3353_s1 + $0x30] sm:$0xff] (!%p441_p9)   ;;  %v2580_v10 = vld [vmem:[%s3353_s1 + $0x38] sm:$0xff] (!%p441_p9)   ;;  %696 = vst [vmem:[#allocation3] sm:$0xff] (!%p441_p9), %v2761_v28  ;;  %vm2043_vm2 = vcmask (!%p441_p9), 1040384   ;;  %s485_s17 = sand.u32 (!%p441_p9), 1, %s2751_s19  }
  0x12   : > { %2410 = vmatprep.subr.bf16.mxu0 (!%p441_p9), %v2574_v1  ;;  %v2586_v7 = vld [vmem:[%s3355_s3] sm:$0xff] (!%p441_p9)   ;;  %2268 = vmatprep.subr.bf16.mxu1 (!%p441_p9), %v2585_v6  ;;  %v2587_v14 = vld [vmem:[%s3355_s3 + $0x48] sm:$0xff] (!%p441_p9)   ;;  %v2589_v16 = vld [vmem:[%s3355_s3 + $0x50] sm:$0xff] (!%p441_p9)   ;;  %s2252_s23 = sshll.u32 (!%p441_p9), %s2865_s22, 4  ;;  %s486_s27 = scalar_lea.vmem (!%p441_p9), [#allocation4], %s485_s17 }
  0x13   : > { %2269 = vmatpush3.bf16.msra.mxu1 (!%p441_p9), %v2586_v7  ;;  %v2588_v15 = vld [vmem:[%s3355_s3 + $0x8] sm:$0xff] (!%p441_p9)   ;;  %v2590_v17 = vld [vmem:[%s3355_s3 + $0x80] sm:$0xff] (!%p441_p9)   ;;  %v2591_v18 = vld [vmem:[%s3355_s3 + $0x10] sm:$0xff] (!%p441_p9)   ;;  %s3310_s29 = scalar_lea.hbm (!%p441_p9), %s3367_s15, %s2252_s23  ;;  %s2058_s18 = scalar_lea.sflag (!%p441_p9), [#allocation5], %s485_s17 }
  0x14   : > { %2270 = vmatprep.subr.bf16.mxu1 (!%p441_p9), %v2587_v14  ;;  %v2592_v19 = vld [vmem:[%s3355_s3 + $0x58] sm:$0xff] (!%p441_p9)   ;;  %v2593_v20 = vld [vmem:[%s3355_s3 + $0x88] sm:$0xff] (!%p441_p9)   ;;  %v2595_v22 = vld [vmem:[%s3355_s3 + $0x60] sm:$0xff] (!%p441_p9)  }
  0x15   : > { %2411 = vmatpush3.bf16.msra.mxu0 (!%p441_p9), %v2574_v1  ;;  %v2594_v21 = vld [vmem:[%s3355_s3 + $0x18] sm:$0xff] (!%p441_p9)   ;;  %v2596_v23 = vld [vmem:[%s3355_s3 + $0x90] sm:$0xff] (!%p441_p9)   ;;  %v2597_v24 = vld [vmem:[%s3355_s3 + $0x20] sm:$0xff] (!%p441_p9)  }
  0x16   : > { %2412 = vmatprep.subr.bf16.mxu0 (!%p441_p9), %v2575_v2  ;;  %v2598_v25 = vld [vmem:[%s3355_s3 + $0x68] sm:$0xff] (!%p441_p9)   ;;  %v2599_v26 = vld [vmem:[%s3355_s3 + $0x98] sm:$0xff] (!%p441_p9)   ;;  %v2601_v29 = vld [vmem:[%s3355_s3 + $0x70] sm:$0xff] (!%p441_p9)  }
  0x17   : > { %s488_s25 = scalar_select %p487_p10, %s2865_s22, 1  ;;  %2271 = vmatpush3.bf16.msra.mxu1 %v2588_v15  ;;  %v2600_v27 = vld [vmem:[%s3355_s3 + $0x28] sm:$0xff]   ;;  %v2602_v30 = vld [vmem:[%s3355_s3 + $0xa0] sm:$0xff]   ;;  %v2603_v31 = vld [vmem:[%s3355_s3 + $0x30] sm:$0xff]  }
  0x18   : > { %2272 = vmatprep.subr.bf16.mxu1 %v2589_v16  ;;  %v2604_v32 = vld [vmem:[%s3355_s3 + $0x78] sm:$0xff]   ;;  %v2605_v33 = vld [vmem:[%s3355_s3 + $0xa8] sm:$0xff]   ;;  %v2607_v35 = vld [vmem:[%s3355_s3 + $0xb0] sm:$0xff]   ;;  %s2763_s22 = smov [#allocation4]  }
  0x19   : > { %s2255_s20 = sshll.u32 %s488_s25, 5  ;;  %2413 = vmatpush3.bf16.msra.mxu0 %v2575_v2  ;;  %v2606_v34 = vld [vmem:[%s3355_s3 + $0x38] sm:$0xff]   ;;  %v2131_v37 = vld [vmem:[%s3354_s2] ss:$0 sm:$0xff]  ;;  %s2070_s25 = sshll.u32 %s486_s27, 4  ;;  %s3312_s25 = int_to_ptr.vmem [resolvable:$true] %s2070_s25 }
  0x1a   : > { %s491_s30 = scalar_lea.vmem %s3352_s0, %s2255_s20  ;;  %2414 = vmatprep.subr.bf16.mxu0 %v2576_v3  ;;  %v2608_v36 = vld [vmem:[%s3355_s3 + $0xb8] sm:$0xff]   ;;  %s2697_s26 = scalar_lea.vmem %s3312_s25, 16 }
  0x1b   : > { %v2581_v4 = vld [vmem:[%s491_s30] sm:$0xff]   ;;  %v2582_v11 = vld [vmem:[%s491_s30 + $0x8] sm:$0xff]   ;;  %v2583_v12 = vld [vmem:[%s491_s30 + $0x10] sm:$0xff]   ;;  %2273 = vmatpush3.bf16.msra.mxu1 %v2591_v18  ;;  %p2698_p11 = scmp.ne.s32.totalorder %s3312_s25, %s2697_s26  ;;  %s2701_s16 = sshll.u32 %s2763_s22, 4  ;;  %s2702_s16 = int_to_ptr.vmem [resolvable:$false] %s2701_s16 }
  0x1c   : > { %2424 = vmatprep.mubr.bf16.mxu0 %v2581_v4  ;;  %v2584_v13 = vld [vmem:[%s491_s30 + $0x18] sm:$0x7f]   ;;  %2274 = vmatprep.subr.bf16.mxu1 %v2592_v19  ;;  %s2703_s30 = scalar_lea.vmem %s2702_s16, 32  ;;  %p2704_p0 = scmp.lt.s32.totalorder %s3312_s25, %s2702_s16 }
  0x1d   : > { %2415 = vmatpush3.bf16.msra.mxu0 %v2576_v3  ;;  %p2699_p12 = pnand %p2698_p11, %p2882_p5  ;;  %p2705_p1 = scmp.lt.s32.totalorder %s2703_s30, %s2697_s26 }
  0x1e   : > { %2416 = vmatprep.subr.bf16.mxu0 %v2577_v5 }
  0x1f   : > { %2275 = vmatpush3.bf16.msra.mxu1 %v2594_v21  ;;  %p2700_p13 = pneg %p2699_p12  ;;  %p2706_p2 = por %p2705_p1, %p2704_p0 }
  0x20   : > { %2276 = vmatprep.subr.bf16.mxu1 %v2595_v22 }
  0x21   : > { %2417 = vmatpush3.bf16.msra.mxu0 %v2577_v5  ;;  %p2707_p3 = pnand %p2706_p2, %p2700_p13 }
  0x22   : > { %2418 = vmatprep.subr.bf16.mxu0 %v2578_v8 }
  0x23   : > { %2277 = vmatpush3.bf16.msra.mxu1 %v2597_v24 }
  0x24   : > { %2278 = vmatprep.subr.bf16.mxu1 %v2598_v25  ;;  %v2609_v25 = vld [vmem:[%s3357_s5 + $0x40] sm:$0xff]  }
  0x25   : > { %2419 = vmatpush3.bf16.msra.mxu0 %v2578_v8 }
  0x26   : > { %2420 = vmatprep.subr.bf16.mxu0 %v2579_v9 }
  0x27   : > { %2279 = vmatpush3.bf16.msra.mxu1 %v2600_v27  ;;  %v2611_v27 = vld [vmem:[%s3357_s5 + $0x48] sm:$0xff]  }
  0x28   : > { %2280 = vmatprep.subr.bf16.mxu1 %v2601_v29  ;;  %v2612_v29 = vld [vmem:[%s3357_s5 + $0x8] sm:$0xff]  }
  0x29   : > { %2421 = vmatpush3.bf16.msra.mxu0 %v2579_v9 }
  0x2a   : > { %2422 = vmatprep.subr.bf16.mxu0 %v2580_v10 }
  0x2b   : > { %2281 = vmatpush3.bf16.msra.mxu1 %v2603_v31  ;;  %v2614_v31 = vld [vmem:[%s3357_s5 + $0x10] sm:$0xff]  }
  0x2c   : > { %2282 = vmatprep.subr.bf16.mxu1 %v2604_v32  ;;  %v2615_v32 = vld [vmem:[%s3357_s5 + $0x58] sm:$0xff]  }
  0x2d   : > { %2423 = vmatpush3.bf16.msra.mxu0 %v2580_v10 }
  0x2e   : > { %2432 = vmatprep.subr.bf16.mxu0 %v2590_v17 }
  0x2f   : > { %2283 = vmatpush3.bf16.msra.mxu1 %v2606_v34  ;;  %v2617_v34 = vld [vmem:[%s3357_s5 + $0x60] sm:$0xff]  }
  0x30   : > { %2425 = vmatmul.mubr.bf16.vlgmr.msra.gmra.mrb[0].mxu0 %v2582_v11  ;;  %2306 = vmatprep.subr.bf16.mxu1 %v2609_v25  ;;  %v2632_v25 = vld [vmem:[%s3359_s7 + $0x90] sm:$0xff]  }
  0x31   : > { %2428 = vmatprep.mubr.bf16.mxu0 %v2583_v12  ;;  %2433 = vmatpush3.bf16.msra.mxu0 %v2590_v17 }
  0x32   : > { %2434 = vmatprep.subr.bf16.mxu0 %v2593_v20 }
  0x35   : > { %2435 = vmatpush3.bf16.msra.mxu0 %v2593_v20 }
  0x36   : > { %2436 = vmatprep.subr.bf16.mxu0 %v2596_v23 }
  0x38   : > { %2429 = vmatmul.mubr.bf16.gmra.mrb[4].mxu0 %v2584_v13 }
  0x39   : > { %2437 = vmatpush3.bf16.msra.mxu0 %v2596_v23 }
  0x3a   : > { %2438 = vmatprep.subr.bf16.mxu0 %v2599_v26 }
  0x3d   : > { %2439 = vmatpush3.bf16.msra.mxu0 %v2599_v26  ;;  %v2610_v26 = vld [vmem:[%s3357_s5] sm:$0xff]  }
  0x3e   : > { %2440 = vmatprep.subr.bf16.mxu0 %v2602_v30 }
  0x41   : > { %2441 = vmatpush3.bf16.msra.mxu0 %v2602_v30  ;;  %v2613_v30 = vld [vmem:[%s3357_s5 + $0x50] sm:$0xff]  }
  0x42   : > { %2442 = vmatprep.subr.bf16.mxu0 %v2605_v33 }
  0x45   : > { %2443 = vmatpush3.bf16.msra.mxu0 %v2605_v33  ;;  %v2616_v33 = vld [vmem:[%s3357_s5 + $0x18] sm:$0xff]  }
  0x46   : > { %2444 = vmatprep.subr.bf16.mxu0 %v2607_v35 }
  0x49   : > { %2445 = vmatpush3.bf16.msra.mxu0 %v2607_v35  ;;  %v2618_v35 = vld [vmem:[%s3357_s5 + $0x20] sm:$0xff]  }
  0x4a   : > { %2446 = vmatprep.subr.bf16.mxu0 %v2608_v36 }
  0x4d   : > { %2447 = vmatpush3.bf16.msra.mxu0 %v2608_v36  ;;  %v2619_v36 = vld [vmem:[%s3357_s5 + $0x68] sm:$0xff]  }
 0x103   : > { %v2426_v38 = vpop.f32.mrb[0].mxu0 }
 0x104   : > { %v639_v39 = vadd.f32 %v2426_v38, %v2131_v37  ;;  %v630_v40 = vpop.f32.mrb[1].mxu0  ;;  %v2621_v38 = vld [vmem:[%s3357_s5 + $0x70] sm:$0xff]  }
 0x105   : > { %v631_v41 = vadd.f32 %v2131_v37, %v630_v40  ;;  %v2427_v42 = vpop.f32.mrb[2].mxu0  ;;  %v2623_v40 = vld [vmem:[%s3357_s5 + $0x78] sm:$0xff]  }
 0x106   : > { %v663_v43 = vmax.f32 %v639_v39, 0.0  ;;  %v642_v44 = vadd.f32 %v2427_v42, %v2131_v37  ;;  %v633_v45 = vpop.f32.mrb[3].mxu0  ;;  %v2622_v39 = vld [vmem:[%s3357_s5 + $0x30] sm:$0xff]   ;;  %v2625_v42 = vld [vmem:[%s3359_s7 + $0x40] sm:$0xff]  }
 0x107   : > { %v661_v46 = vmax.f32 %v631_v41, 0.0  ;;  %v634_v47 = vadd.f32 %v2131_v37, %v633_v45  ;;  %v2624_v41 = vld [vmem:[%s3357_s5 + $0x38] sm:$0xff]   ;;  %2328 = vmatprep.subr.bf16.mxu0 %v2625_v42 }
 0x108   : > { %671 = vst [vmem:[#allocation2 + $0x10] sm:$0xff] %v663_v43  ;;  %v664_v48 = vmax.f32 %v642_v44, 0.0  ;;  %v2648_v42 = vld [vmem:[%s3359_s7 + $0x38] sm:$0xff]  }
 0x109   : > { %669 = vst [vmem:[#allocation2] sm:$0xff] %v661_v46  ;;  %v662_v49 = vmax.f32 %v634_v47, 0.0 }
 0x10a   : > { %672 = vst [vmem:[#allocation2 + $0x18] sm:$0xff] %v664_v48 }
 0x10b   : > { %670 = vst [vmem:[#allocation2 + $0x8] sm:$0xff] %v662_v49  ;;  %v2430_v50 = vpop.f32.mrb[4].mxu0  ;;  %v2144_v49 = vld [vmem:[%s3356_s4] ss:$0 sm:$0xff] }
 0x10c   : > { %v655_v51 = vadd.f32 %v2430_v50, %v2131_v37  ;;  %v646_v52 = vpop.f32.mrb[5].mxu0 }
 0x10d   : > { %v647_v53 = vadd.f32 %v2131_v37, %v646_v52  ;;  %v2431_v54 = vpop.f32.mrb[6].mxu0 }
 0x10e   : > { %v667_v55 = vmax.f32 %v655_v51, 0.0  ;;  %v658_v56 = vadd.f32 %v2431_v54, %v2131_v37  ;;  %v649_v57 = vpop.f32.mrb[7].mxu0 }
 0x10f   : > { %v665_v58 = vmax.f32 %v647_v53, 0.0  ;;  %v650_v59 = vadd.f32 %v2131_v37, %v649_v57  ;;  %v2620_v37 = vld [vmem:[%s3357_s5 + $0x28] sm:$0xff]  }
 0x110   : > { %675 = vst [vmem:[#allocation2 + $0x30] sm:$0xff] %v667_v55  ;;  %v668_v60 = vmax.f32 %v658_v56, 0.0 }
 0x111   : > { %673 = vst [vmem:[#allocation2 + $0x20] sm:$0xff] %v665_v58  ;;  %v666_v61 = vmax.f32 %v650_v59, 0.0  ;;  %v679_v62 = vld [vmem:[#allocation2 + $0x10] ss:$2 sm:$0xff]  ;;  %v687_v63 = vld [vmem:[#allocation2 + $0x11] ss:$2 sm:$0xff] }
 0x112   : > { %676 = vst [vmem:[#allocation2 + $0x38] sm:$0x1f] %v668_v60  ;;  %v677_v0 = vld [vmem:[#allocation2] ss:$2 sm:$0xff]  ;;  %v685_v1 = vld [vmem:[#allocation2 + $0x1] ss:$2 sm:$0xff]  ;;  %v693_v2 = vmax.f32 %v679_v62, %v687_v63 }
 0x113   : > { %674 = vst [vmem:[#allocation2 + $0x28] sm:$0xff] %v666_v61  ;;  %v692_v3 = vmax.f32 %v677_v0, %v685_v1 }
 0x114   : > { %702 = vst [vmem:[#allocation3 + $0x10] sm:$0xff] %v693_v2 }
 0x115   : > { %701 = vst [vmem:[#allocation3 + $0x8] sm:$0xff] %v692_v3  ;;  %v718_v4 = vpack.c.bf16 %v693_v2, %v692_v3 }
 0x117   : > { %954 = vmatprep.mubr.bf16.mxu1 %v718_v4 }
 0x119   : > { %v683_v5 = vld [vmem:[#allocation2 + $0x30] ss:$2 sm:$0x3f]  ;;  %v691_v6 = vld [vmem:[#allocation2 + $0x31] ss:$2 sm:$0x3f] }
 0x11a   : > { %v695_v7 = vmax.f32 %v683_v5, %v691_v6  ;;  %v681_v8 = vld [vmem:[#allocation2 + $0x20] ss:$2 sm:$0xff]  ;;  %v689_v9 = vld [vmem:[#allocation2 + $0x21] ss:$2 sm:$0xff] }
 0x11b   : > { %v694_v10 = vmax.f32 %v681_v8, %v689_v9 }
 0x11c   : > { %704 = vst [vmem:[#allocation3 + $0x20] sm:$0x3f] %v695_v7  ;;  %v705_v11 = vld [vmem:[#allocation3 + $0x7] sm:$0xff]  ;;  %v706_v12 = vld [vmem:[#allocation3 + $0xf] sm:$0xff] }
 0x11d   : > { %703 = vst [vmem:[#allocation3 + $0x18] sm:$0xff] %v694_v10  ;;  %1034 = vst [vmem:[#allocation3] sm:$0xff] %v2761_v28  ;;  %v717_v13 = vpack.c.bf16 %v706_v12, %v705_v11  ;;  %v713_v14 = vld [vmem:[#allocation3 + $0x9] sm:$0xff] }
 0x11f   : > { %955 = vmatmul.mubr.bf16.vlgmr.msra.gmra.mrb[0].mxu1 %v717_v13 }
 0x120   : > { %2307 = vmatpush3.bf16.msra.mxu1 %v2610_v26  ;;  %v2633_v26 = vld [vmem:[%s3359_s7 + $0x10] sm:$0xff]  }
 0x121   : > { %2308 = vmatprep.subr.bf16.mxu1 %v2611_v27  ;;  %v2634_v27 = vld [vmem:[%s3359_s7 + $0x58] sm:$0xff]  }
 0x123   : > { %v712_v15 = vld [vmem:[#allocation3 + $0x20] sm:$0x3f] }
 0x124   : > { %v716_v16 = vld [vmem:[#allocation3 + $0x21] sm:$0x3f]  ;;  %v707_v17 = vld [vmem:[#allocation3 + $0x17] sm:$0xff]  ;;  %v721_v19 = vpack.c.bf16 %v712_v15, %v694_v10  ;;  %2309 = vmatpush3.bf16.msra.mxu1 %v2612_v29 }
 0x125   : > { %v714_v18 = vld [vmem:[#allocation3 + $0x11] sm:$0xff]  ;;  %v708_v20 = vld [vmem:[#allocation3 + $0x1f] sm:$0x3f]  ;;  %2310 = vmatprep.subr.bf16.mxu1 %v2613_v30 }
 0x126   : > { %1036 = vst [vmem:[#allocation3 + $0x10] sm:$0xff] %v2761_v28  ;;  %v719_v21 = vpack.c.bf16 %v714_v18, %v713_v14  ;;  %v715_v22 = vld [vmem:[#allocation3 + $0x19] sm:$0xff]  ;;  %v720_v23 = vpack.c.bf16 %v708_v20, %v707_v17  ;;  %962 = vmatprep.mubr.bf16.mxu1 %v721_v19 }
 0x127   : > { %1529 = vst [vmem:[#allocation3 + $0x18] sm:$0xff] %v2761_v28  ;;  %v722_v24 = vpack.c.bf16 %v716_v16, %v715_v22  ;;  %1530 = vst [vmem:[#allocation3 + $0x20] sm:$0xff] %v2761_v28  ;;  %v2626_v19 = vld [vmem:[%s3359_s7 + $0x80] sm:$0xff]   ;;  %v2629_v22 = vld [vmem:[%s3359_s7 + $0x88] sm:$0xff]  }
 0x128   : > { %2448 = vmatprep.mubr.bf16.mxu0 %v719_v21  ;;  %963 = vmatmul.mubr.bf16.gmra.mrb[4].mxu1 %v720_v23  ;;  %v2627_v20 = vld [vmem:[%s3359_s7] sm:$0xff]   ;;  %v2628_v21 = vld [vmem:[%s3359_s7 + $0x48] sm:$0xff]   ;;  %v2635_v29 = vld [vmem:[%s3359_s7 + $0x98] sm:$0xff]  }
 0x129   : > { %2449 = vmatmul.mubr.bf16.vlgmr.msra.gmra.mrb[8].mxu0 %v722_v24  ;;  %2311 = vmatpush3.bf16.msra.mxu1 %v2614_v31  ;;  %v2630_v23 = vld [vmem:[%s3359_s7 + $0x8] sm:$0xff]   ;;  %v2631_v24 = vld [vmem:[%s3359_s7 + $0x50] sm:$0xff]   ;;  %v2636_v30 = vld [vmem:[%s3359_s7 + $0x18] sm:$0xff]  }
 0x12a   : > { %2312 = vmatprep.subr.bf16.mxu1 %v2615_v32  ;;  %2329 = vmatpush3.bf16.msra.mxu0 %v2627_v20  ;;  %v2637_v31 = vld [vmem:[%s3359_s7 + $0x60] sm:$0xff]   ;;  %v2671_v20 = vld [vmem:[%s3361_s9 + $0xb8] sm:$0xff]  }
 0x12b   : > { %2330 = vmatprep.subr.bf16.mxu0 %v2628_v21  ;;  %v2638_v32 = vld [vmem:[%s3359_s7 + $0xa0] sm:$0xff]   ;;  %v2672_v21 = vld [vmem:[%s3361_s9 + $0x38] sm:$0xff]  }
 0x12d   : > { %2313 = vmatpush3.bf16.msra.mxu1 %v2616_v33  ;;  %v2639_v33 = vld [vmem:[%s3359_s7 + $0x20] sm:$0xff]  }
 0x12e   : > { %2314 = vmatprep.subr.bf16.mxu1 %v2617_v34  ;;  %2331 = vmatpush3.bf16.msra.mxu0 %v2630_v23  ;;  %v2640_v34 = vld [vmem:[%s3359_s7 + $0x68] sm:$0xff]  }
 0x12f   : > { %2332 = vmatprep.subr.bf16.mxu0 %v2631_v24 }
 0x131   : > { %2315 = vmatpush3.bf16.msra.mxu1 %v2618_v35  ;;  %v2641_v35 = vld [vmem:[%s3359_s7 + $0xa8] sm:$0xff]  }
 0x132   : > { %2316 = vmatprep.subr.bf16.mxu1 %v2619_v36  ;;  %2333 = vmatpush3.bf16.msra.mxu0 %v2633_v26  ;;  %v2642_v36 = vld [vmem:[%s3359_s7 + $0x28] sm:$0xff]  }
 0x133   : > { %2334 = vmatprep.subr.bf16.mxu0 %v2634_v27 }
 0x135   : > { %2317 = vmatpush3.bf16.msra.mxu1 %v2620_v37  ;;  %v2643_v37 = vld [vmem:[%s3359_s7 + $0x70] sm:$0xff]  }
 0x136   : > { %2318 = vmatprep.subr.bf16.mxu1 %v2621_v38  ;;  %2335 = vmatpush3.bf16.msra.mxu0 %v2636_v30  ;;  %v2644_v38 = vld [vmem:[%s3359_s7 + $0xb0] sm:$0xff]  }
 0x137   : > { %2336 = vmatprep.subr.bf16.mxu0 %v2637_v31 }
 0x139   : > { %2319 = vmatpush3.bf16.msra.mxu1 %v2622_v39  ;;  %v2645_v39 = vld [vmem:[%s3359_s7 + $0x30] sm:$0xff]  }
 0x13a   : > { %2320 = vmatprep.subr.bf16.mxu1 %v2623_v40  ;;  %2337 = vmatpush3.bf16.msra.mxu0 %v2639_v33  ;;  %v2646_v40 = vld [vmem:[%s3359_s7 + $0x78] sm:$0xff]  }
 0x13b   : > { %2338 = vmatprep.subr.bf16.mxu0 %v2640_v34 }
 0x13d   : > { %2321 = vmatpush3.bf16.msra.mxu1 %v2624_v41  ;;  %v2647_v41 = vld [vmem:[%s3359_s7 + $0xb8] sm:$0xff]  }
 0x13e   : > { %2452 = vmatprep.subr.bf16.mxu1 %v2761_v28  ;;  %2339 = vmatpush3.bf16.msra.mxu0 %v2642_v36 }
 0x13f   : > { %2340 = vmatprep.subr.bf16.mxu0 %v2643_v37 }
 0x142   : > { %2341 = vmatpush3.bf16.msra.mxu0 %v2645_v39 }
 0x143   : > { %2342 = vmatprep.subr.bf16.mxu0 %v2646_v40 }
 0x146   : > { %2343 = vmatpush3.bf16.msra.mxu0 %v2648_v42 }
 0x1f2   : > { %v2284_v43 = vpop.f32.mrb[0].mxu1 }
 0x1f3   : > { %v2285_v44 = vpop.f32.mrb[1].mxu1 }
 0x1f4   : > { %v2286_v45 = vadd.f32 %v2285_v44, %v2284_v43  ;;  %v2287_v46 = vpop.f32.mrb[2].mxu1  ;;  %v2169_v44 = vld [vmem:[%s3358_s6] ss:$0 sm:$0xff] }
 0x1f5   : > { %v2288_v47 = vpop.f32.mrb[3].mxu1 }
 0x1f6   : > { %v2289_v48 = vadd.f32 %v2288_v47, %v2287_v46  ;;  %v957_v53 = vadd.f32 %v2286_v45, %v2144_v49 }
 0x1f8   : > { %v960_v60 = vadd.f32 %v2289_v48, %v2144_v49 }
 0x1fb   : > { %v2290_v50 = vpop.f32.mrb[4].mxu1 }
 0x1fc   : > { %v2450_v51 = vpop.f32.mrb[8].mxu0  ;;  %v2291_v52 = vpop.f32.mrb[5].mxu1 }
 0x1fd   : > { %v2292_v54 = vadd.f32 %v2291_v52, %v2290_v50  ;;  %v1005_v55 = vpop.f32.mrb[9].mxu0  ;;  %v2293_v56 = vpop.f32.mrb[6].mxu1 }
 0x1fe   : > { %v1006_v57 = vadd.f32 %v1005_v55, %v957_v53  ;;  %v2451_v58 = vpop.f32.mrb[10].mxu0  ;;  %v2294_v59 = vpop.f32.mrb[7].mxu1 }
 0x1ff   : > { %v965_v61 = vadd.f32 %v2292_v54, %v2144_v49  ;;  %v2295_v62 = vadd.f32 %v2294_v59, %v2293_v56  ;;  %v1008_v63 = vpop.f32.mrb[11].mxu0 }
 0x200   : > { %v1020_v0 = vmax.f32 %v1006_v57, 0.0  ;;  %v1009_v1 = vadd.f32 %v1008_v63, %v960_v60  ;;  %v2650_v63 = vld [vmem:[%s3361_s9 + $0x80] sm:$0xff]  }
 0x201   : > { %v1014_v2 = vadd.f32 %v2450_v51, %v965_v61  ;;  %v968_v3 = vadd.f32 %v2295_v62, %v2144_v49  ;;  %v2649_v62 = vld [vmem:[%s3361_s9 + $0x40] sm:$0xff]  }
 0x202   : > { %1024 = vst [vmem:[#allocation2] sm:$0xff] %v1020_v0  ;;  %v1021_v4 = vmax.f32 %v1009_v1, 0.0  ;;  %v2651_v0 = vld [vmem:[%s3361_s9] sm:$0xff]   ;;  %2359 = vmatprep.subr.bf16.mxu0 %v2649_v62  ;;  %v2652_v1 = vld [vmem:[%s3361_s9 + $0x48] sm:$0xff]  }
 0x203   : > { %v1022_v5 = vmax.f32 %v1014_v2, 0.0  ;;  %v1017_v6 = vadd.f32 %v2451_v58, %v968_v3  ;;  %v2653_v2 = vld [vmem:[%s3361_s9 + $0x88] sm:$0xff]  }
 0x204   : > { %1025 = vst [vmem:[#allocation2 + $0x8] sm:$0xff] %v1021_v4  ;;  %v2654_v3 = vld [vmem:[%s3361_s9 + $0x8] sm:$0xff]   ;;  %v2655_v4 = vld [vmem:[%s3361_s9 + $0x50] sm:$0xff]  }
 0x205   : > { %1026 = vst [vmem:[#allocation2 + $0x10] sm:$0xff] %v1022_v5  ;;  %v1023_v7 = vmax.f32 %v1017_v6, 0.0  ;;  %v2656_v5 = vld [vmem:[%s3361_s9 + $0x90] sm:$0xff]  }
 0x206   : > { %v2657_v6 = vld [vmem:[%s3361_s9 + $0x10] sm:$0xff]  }
 0x207   : > { %1027 = vst [vmem:[#allocation2 + $0x18] sm:$0x3f] %v1023_v7  ;;  %v2658_v7 = vld [vmem:[%s3361_s9 + $0x58] sm:$0xff]  }
 0x20b   : > { %v1028_v8 = vld [vmem:[#allocation2] ss:$2 sm:$0xff]  ;;  %v1030_v9 = vld [vmem:[#allocation2 + $0x1] ss:$2 sm:$0xff] }
 0x20c   : > { %v1032_v10 = vmax.f32 %v1028_v8, %v1030_v9  ;;  %v2659_v8 = vld [vmem:[%s3361_s9 + $0x98] sm:$0xff]  }
 0x20d   : > { %v2660_v9 = vld [vmem:[%s3361_s9 + $0x18] sm:$0xff]  }
 0x20e   : > { %v1029_v11 = vld [vmem:[#allocation2 + $0x10] ss:$2 sm:$0x7f]  ;;  %v1031_v12 = vld [vmem:[#allocation2 + $0x11] ss:$2 sm:$0x7f] }
 0x20f   : > { %1039 = vst [vmem:[#allocation3 + $0x8] sm:$0xff] %v1032_v10  ;;  %v1033_v13 = vmax.f32 %v1029_v11, %v1031_v12  ;;  %v2662_v11 = vld [vmem:[%s3361_s9 + $0xa0] sm:$0xff]  }
 0x210   : > { %v2663_v12 = vld [vmem:[%s3361_s9 + $0x20] sm:$0xff]  }
 0x211   : > { %1040 = vst [vmem:[#allocation3 + $0x10] sm:$0x7f] %v1033_v13  ;;  %v2664_v13 = vld [vmem:[%s3361_s9 + $0x68] sm:$0xff]  }
 0x216   : > { %v1041_v14 = vld [vmem:[#allocation3 + $0x7] sm:$0xff] }
 0x217   : > { %1230 = vst [vmem:[#allocation3] sm:$0xff] %v2761_v28 }
 0x218   : > { %v1042_v15 = vld [vmem:[#allocation3 + $0xf] sm:$0xff] }
 0x219   : > { %v1044_v16 = vld [vmem:[#allocation3 + $0x10] sm:$0xff]  ;;  %v1045_v18 = vpack.c.bf16 %v1042_v15, %v1041_v14  ;;  %v2665_v14 = vld [vmem:[%s3361_s9 + $0xa8] sm:$0xff]  }
 0x21a   : > { %v1046_v17 = vpack.c.bf16 %v1044_v16, %v1032_v10  ;;  %1232 = vst [vmem:[#allocation3 + $0x10] sm:$0xff] %v2761_v28  ;;  %v2661_v10 = vld [vmem:[%s3361_s9 + $0x60] sm:$0xff]   ;;  %v2666_v15 = vld [vmem:[%s3361_s9 + $0x28] sm:$0xff]   ;;  %v2667_v16 = vld [vmem:[%s3361_s9 + $0x70] sm:$0xff]  }
 0x21c   : > { %1214 = vmatprep.mubr.bf16.mxu1 %v1046_v17  ;;  %v2668_v17 = vld [vmem:[%s3361_s9 + $0xb0] sm:$0xff]  }
 0x21d   : > { %1215 = vmatmul.mubr.bf16.vlgmr.msra.gmra.mrb[8].mxu1 %v1045_v18  ;;  %v2669_v18 = vld [vmem:[%s3361_s9 + $0x30] sm:$0xff]  }
 0x21e   : > { %2453 = vmatpush3.bf16.msra.mxu1 %v2626_v19  ;;  %2468 = vmatprep.mubr.msk.bf16.mxu1 %vm2762_vm0, %v2761_v28  ;;  %v2670_v19 = vld [vmem:[%s3361_s9 + $0x78] sm:$0xff]  }
 0x21f   : > { %2454 = vmatprep.subr.bf16.mxu1 %v2761_v28 }
 0x222   : > { %2455 = vmatpush3.bf16.msra.mxu1 %v2629_v22 }
 0x223   : > { %2456 = vmatprep.subr.bf16.mxu1 %v2761_v28 }
 0x226   : > { %2457 = vmatpush3.bf16.msra.mxu1 %v2632_v25  ;;  %v2186_v25 = vld [vmem:[%s3360_s8] ss:$0 sm:$0xff] }
 0x227   : > { %2458 = vmatprep.subr.bf16.mxu1 %v2761_v28 }
 0x22a   : > { %2459 = vmatpush3.bf16.msra.mxu1 %v2635_v29 }
 0x22b   : > { %2460 = vmatprep.subr.bf16.mxu1 %v2761_v28 }
 0x22e   : > { %2461 = vmatpush3.bf16.msra.mxu1 %v2638_v32 }
 0x22f   : > { %2462 = vmatprep.subr.bf16.mxu1 %v2761_v28 }
 0x232   : > { %2463 = vmatpush3.bf16.msra.mxu1 %v2641_v35 }
 0x233   : > { %2464 = vmatprep.subr.bf16.mxu1 %v2761_v28 }
 0x236   : > { %2465 = vmatpush3.bf16.msra.mxu1 %v2644_v38 }
 0x237   : > { %2466 = vmatprep.subr.bf16.mxu1 %v2761_v28 }
 0x23a   : > { %2467 = vmatpush3.bf16.msra.mxu1 %v2647_v41 }
 0x23b   : > { %2472 = vmatprep.subr.bf16.mxu1 %v2761_v28 }
 0x2f0   : > { %v2322_v43 = vpop.f32.mrb[8].mxu1 }
 0x2f1   : > { %v2323_v45 = vpop.f32.mrb[9].mxu1 }
 0x2f2   : > { %v2324_v46 = vadd.f32 %v2323_v45, %v2322_v43  ;;  %v2325_v47 = vpop.f32.mrb[10].mxu1  ;;  %v2673_v45 = vld [vmem:[%s3363_s11] sm:$0xff]  }
 0x2f3   : > { %v2326_v48 = vpop.f32.mrb[11].mxu1 }
 0x2f4   : > { %v1217_v49 = vadd.f32 %v2324_v46, %v2169_v44  ;;  %v2327_v50 = vadd.f32 %v2326_v48, %v2325_v47  ;;  %v2674_v46 = vld [vmem:[%s3363_s11 + $0x8] sm:$0xff]   ;;  %v2675_v47 = vld [vmem:[%s3363_s11 + $0x10] sm:$0xff]   ;;  %v2676_v48 = vld [vmem:[%s3363_s11 + $0x18] sm:$0xff]  }
 0x2f6   : > { %v1223_v51 = vmax.f32 %v1217_v49, 0.0  ;;  %v1220_v52 = vadd.f32 %v2327_v50, %v2169_v44  ;;  %v2677_v49 = vld [vmem:[%s3363_s11 + $0x20] sm:$0xff]   ;;  %v2678_v50 = vld [vmem:[%s3363_s11 + $0x28] sm:$0xff]  }
 0x2f8   : > { %1225 = vst [vmem:[#allocation2] sm:$0xff] %v1223_v51  ;;  %v1224_v53 = vmax.f32 %v1220_v52, 0.0  ;;  %v2679_v51 = vld [vmem:[%s3363_s11 + $0x30] sm:$0xff]   ;;  %v2680_v52 = vld [vmem:[%s3363_s11 + $0x38] sm:$0xff]  }
 0x2fa   : > { %1226 = vst [vmem:[#allocation2 + $0x8] sm:$0xff] %v1224_v53 }
 0x301   : > { %v1227_v54 = vld [vmem:[#allocation2] ss:$2 sm:$0xff]  ;;  %v1228_v55 = vld [vmem:[#allocation2 + $0x1] ss:$2 sm:$0xff] }
 0x302   : > { %v1229_v56 = vmax.f32 %v1227_v54, %v1228_v55 }
 0x304   : > { %1235 = vst [vmem:[#allocation3 + $0x8] sm:$0xff] %v1229_v56  ;;  %v1240_v57 = vpack.c.bf16 %v1229_v56, %v1229_v56  ;;  %v2211_v56 = vld [vmem:[%s3362_s10] ss:$0 sm:$0xff] }
 0x306   : > { %1473 = vmatprep.mubr.bf16.mxu0 %v1240_v57 }
 0x30b   : > { %v1238_v58 = vld [vmem:[#allocation3 + $0x9] sm:$0xff] }
 0x30c   : > { %v1236_v59 = vld [vmem:[#allocation3 + $0x7] sm:$0xff]  ;;  %v1241_v60 = vpack.c.bf16 %v1238_v58, %v1238_v58  ;;  %1528 = vst [vmem:[#allocation3 + $0x10] sm:$0xff] %v2761_v28 }
 0x30d   : > { %v1239_v61 = vpack.c.bf16 %v1236_v59, %v1236_v59  ;;  %1526 = vst [vmem:[#allocation3] sm:$0xff] %v2761_v28  ;;  %1527 = vst [vmem:[#allocation3 + $0x8] sm:$0xff] %v2761_v28 }
 0x30e   : > { %2469 = vmatmul.mubr.bf16.vlgmr.msra.gmra.mrb[12].mxu1 %v1241_v60 }
 0x30f   : > { %1474 = vmatmul.mubr.bf16.vlgmr.msra.gmra.mrb[12].mxu0 %v1239_v61  ;;  %2488 = vmatprep.mubr.msk.bf16.mxu1 %vm2762_vm0, %v2761_v28 }
 0x310   : > { %2473 = vmatpush3.bf16.msra.mxu1 %v2650_v63  ;;  %2360 = vmatpush3.bf16.msra.mxu0 %v2651_v0 }
 0x311   : > { %2474 = vmatprep.subr.bf16.mxu1 %v2761_v28  ;;  %2361 = vmatprep.subr.bf16.mxu0 %v2652_v1 }
 0x314   : > { %2475 = vmatpush3.bf16.msra.mxu1 %v2653_v2  ;;  %2362 = vmatpush3.bf16.msra.mxu0 %v2654_v3 }
 0x315   : > { %2476 = vmatprep.subr.bf16.mxu1 %v2761_v28  ;;  %2363 = vmatprep.subr.bf16.mxu0 %v2655_v4 }
 0x318   : > { %2477 = vmatpush3.bf16.msra.mxu1 %v2656_v5  ;;  %2364 = vmatpush3.bf16.msra.mxu0 %v2657_v6  ;;  %v2681_v6 = vld [vmem:[%s3365_s13] sm:$0xff]  }
 0x319   : > { %2478 = vmatprep.subr.bf16.mxu1 %v2761_v28  ;;  %2365 = vmatprep.subr.bf16.mxu0 %v2658_v7  ;;  %v2682_v7 = vld [vmem:[%s3365_s13 + $0x8] sm:$0xff]  }
 0x31c   : > { %2479 = vmatpush3.bf16.msra.mxu1 %v2659_v8  ;;  %2366 = vmatpush3.bf16.msra.mxu0 %v2660_v9  ;;  %v2683_v8 = vld [vmem:[%s3365_s13 + $0x10] sm:$0xff]   ;;  %v2684_v9 = vld [vmem:[%s3365_s13 + $0x18] sm:$0xff]  }
 0x31d   : > { %2480 = vmatprep.subr.bf16.mxu1 %v2761_v28  ;;  %2367 = vmatprep.subr.bf16.mxu0 %v2661_v10  ;;  %v2685_v10 = vld [vmem:[%s3365_s13 + $0x20] sm:$0xff]  }
 0x320   : > { %2481 = vmatpush3.bf16.msra.mxu1 %v2662_v11  ;;  %2368 = vmatpush3.bf16.msra.mxu0 %v2663_v12  ;;  %v2686_v11 = vld [vmem:[%s3365_s13 + $0x28] sm:$0xff]   ;;  %v2687_v12 = vld [vmem:[%s3365_s13 + $0x30] sm:$0xff]  }
 0x321   : > { %2482 = vmatprep.subr.bf16.mxu1 %v2761_v28  ;;  %2369 = vmatprep.subr.bf16.mxu0 %v2664_v13  ;;  %v2688_v13 = vld [vmem:[%s3365_s13 + $0x38] sm:$0xff]  }
 0x324   : > { %2483 = vmatpush3.bf16.msra.mxu1 %v2665_v14  ;;  %2370 = vmatpush3.bf16.msra.mxu0 %v2666_v15  ;;  %v1839_v14 = vld [vmem:[%s3364_s12] sm:$0x1] }
 0x325   : > { %2484 = vmatprep.subr.bf16.mxu1 %v2761_v28  ;;  %2371 = vmatprep.subr.bf16.mxu0 %v2667_v16 }
 0x328   : > { %2485 = vmatpush3.bf16.msra.mxu1 %v2668_v17  ;;  %2372 = vmatpush3.bf16.msra.mxu0 %v2669_v18 }
 0x329   : > { %2486 = vmatprep.subr.bf16.mxu1 %v2761_v28  ;;  %2373 = vmatprep.subr.bf16.mxu0 %v2670_v19 }
 0x32c   : > { %2487 = vmatpush3.bf16.msra.mxu1 %v2671_v20  ;;  %2374 = vmatpush3.bf16.msra.mxu0 %v2672_v21 }
 0x32d   : > { %2512 = vmatprep.subr.bf16.mxu1 %v2761_v28  ;;  %2492 = vmatprep.subr.bf16.mxu0 %v2761_v28 }
 0x3e1   : > { %v1515_v22 = vpop.f32.mrb[12].mxu1 }
 0x3e2   : > { %v2344_v23 = vpop.f32.mrb[12].mxu0  ;;  %v2470_v24 = vpop.f32.mrb[13].mxu1 }
 0x3e3   : > { %v2345_v26 = vpop.f32.mrb[13].mxu0  ;;  %v1518_v29 = vpop.f32.mrb[14].mxu1 }
 0x3e4   : > { %v2346_v27 = vadd.f32 %v2345_v26, %v2344_v23  ;;  %v2347_v30 = vpop.f32.mrb[14].mxu0  ;;  %v2471_v31 = vpop.f32.mrb[15].mxu1 }
 0x3e5   : > { %v2348_v32 = vpop.f32.mrb[15].mxu0 }
 0x3e6   : > { %v1476_v33 = vadd.f32 %v2346_v27, %v2186_v25  ;;  %v1950_v27 = vld [vmem:[%s3366_s14] sm:$0x1] }
 0x3e8   : > { %v1516_v34 = vadd.f32 %v1515_v22, %v1476_v33 }
 0x3ea   : > { %v1521_v35 = vmax.f32 %v1516_v34, 0.0 }
 0x3ec   : > { %1522 = vst [vmem:[#allocation2] sm:$0xff] %v1521_v35 }
 0x3f3   : > { %v1523_v36 = vld [vmem:[#allocation2] ss:$2 sm:$0xf]  ;;  %v1524_v37 = vld [vmem:[#allocation2 + $0x1] ss:$2 sm:$0xf] }
 0x3f4   : > { %v1525_v38 = vmax.f32 %v1523_v36, %v1524_v37 }
 0x3f6   : > { %1531 = vst [vmem:[#allocation3 + $0x8] sm:$0xf] %v1525_v38 }
 0x3fd   : > { %v1533_v39 = vld [vmem:[#allocation3 + $0x9] sm:$0x3] }
 0x3fe   : > { %v1534_v40 = vld [vmem:[#allocation3 + $0xa] sm:$0x3]  ;;  %v1532_v41 = vld [vmem:[#allocation3 + $0x8] sm:$0x3]  ;;  %v1536_v42 = vpack.c.bf16 %v1533_v39, %v1533_v39 }
 0x3ff   : > { %v1537_v43 = vpack.c.bf16 %v1534_v40, %v1534_v40  ;;  %v1535_v44 = vpack.c.bf16 %v1532_v41, %v1532_v41 }
 0x400   : > { %1769 = vmatprep.mubr.bf16.mxu0 %v1536_v42 }
 0x401   : > { %2489 = vmatmul.mubr.bf16.vlgmr.msra.gmra.mrb[16].mxu1 %v1537_v43  ;;  %1770 = vmatmul.mubr.bf16.vlgmr.msra.gmra.mrb[16].mxu0 %v1535_v44 }
 0x402   : > { %2528 = vmatprep.mubr.msk.bf16.mxu1 %vm2762_vm0, %v2761_v28  ;;  %2493 = vmatpush3.bf16.msra.mxu0 %v2673_v45 }
 0x403   : > { %2508 = vmatprep.mubr.msk.bf16.mxu0 %vm2762_vm0, %v2761_v28  ;;  %2494 = vmatprep.subr.bf16.mxu0 %v2761_v28 }
 0x404   : > { %2513 = vmatpush3.bf16.msra.mxu1 %v2681_v6 }
 0x405   : > { %2514 = vmatprep.subr.bf16.mxu1 %v2761_v28 }
 0x406   : > { %2495 = vmatpush3.bf16.msra.mxu0 %v2674_v46 }
 0x407   : > { %2496 = vmatprep.subr.bf16.mxu0 %v2761_v28 }
 0x408   : > { %2515 = vmatpush3.bf16.msra.mxu1 %v2682_v7 }
 0x409   : > { %2516 = vmatprep.subr.bf16.mxu1 %v2761_v28 }
 0x40a   : > { %2497 = vmatpush3.bf16.msra.mxu0 %v2675_v47 }
 0x40b   : > { %2498 = vmatprep.subr.bf16.mxu0 %v2761_v28 }
 0x40c   : > { %2517 = vmatpush3.bf16.msra.mxu1 %v2683_v8 }
 0x40d   : > { %2518 = vmatprep.subr.bf16.mxu1 %v2761_v28 }
 0x40e   : > { %2499 = vmatpush3.bf16.msra.mxu0 %v2676_v48 }
 0x40f   : > { %2500 = vmatprep.subr.bf16.mxu0 %v2761_v28 }
 0x410   : > { %2519 = vmatpush3.bf16.msra.mxu1 %v2684_v9 }
 0x411   : > { %2520 = vmatprep.subr.bf16.mxu1 %v2761_v28 }
 0x412   : > { %2501 = vmatpush3.bf16.msra.mxu0 %v2677_v49 }
 0x413   : > { %2502 = vmatprep.subr.bf16.mxu0 %v2761_v28 }
 0x414   : > { %2521 = vmatpush3.bf16.msra.mxu1 %v2685_v10 }
 0x415   : > { %2522 = vmatprep.subr.bf16.mxu1 %v2761_v28 }
 0x416   : > { %2503 = vmatpush3.bf16.msra.mxu0 %v2678_v50 }
 0x417   : > { %2504 = vmatprep.subr.bf16.mxu0 %v2761_v28 }
 0x418   : > { %2523 = vmatpush3.bf16.msra.mxu1 %v2686_v11 }
 0x419   : > { %2524 = vmatprep.subr.bf16.mxu1 %v2761_v28 }
 0x41a   : > { %2505 = vmatpush3.bf16.msra.mxu0 %v2679_v51 }
 0x41b   : > { %2506 = vmatprep.subr.bf16.mxu0 %v2761_v28 }
 0x41c   : > { %2525 = vmatpush3.bf16.msra.mxu1 %v2687_v12 }
 0x41d   : > { %2526 = vmatprep.subr.bf16.mxu1 %v2761_v28  ;;  %v2039_v28 = vlaneseq }
 0x41e   : > { %2507 = vmatpush3.bf16.msra.mxu0 %v2680_v52 }
 0x41f   : > { %v2040_v26 = vand.u32 127, %v2039_v28 }
 0x420   : > { %2527 = vmatpush3.bf16.msra.mxu1 %v2688_v13 }
 0x421   : > { %vm2041_vm1 = vcmp.lt.s32.totalorder %v2040_v26, 10 }
 0x4d4   : > { %v1811_v53 = vpop.f32.mrb[16].mxu1  ;;  %v2375_v54 = vpop.f32.mrb[16].mxu0 }
 0x4d5   : > { %v2490_v55 = vpop.f32.mrb[17].mxu1  ;;  %v2376_v57 = vpop.f32.mrb[17].mxu0 }
 0x4d6   : > { %v1814_v58 = vpop.f32.mrb[18].mxu1  ;;  %v2377_v59 = vadd.f32 %v2376_v57, %v2375_v54  ;;  %v2378_v60 = vpop.f32.mrb[18].mxu0 }
 0x4d7   : > { %v2491_v61 = vpop.f32.mrb[19].mxu1  ;;  %v2379_v62 = vpop.f32.mrb[19].mxu0 }
 0x4d8   : > { %v1772_v63 = vadd.f32 %v2377_v59, %v2211_v56 }
 0x4da   : > { %v1812_v0 = vadd.f32 %v1811_v53, %v1772_v63 }
 0x4dc   : > { %v1817_v1 = vmax.f32 %v1812_v0, 0.0 }
 0x4de   : > { %1818 = vst [vmem:[#allocation2] sm:$0x3] %v1817_v1 }
 0x4e5   : > { %v1819_v2 = vld [vmem:[#allocation2] ss:$2 sm:$0x1]  ;;  %v1820_v3 = vld [vmem:[#allocation2 + $0x1] ss:$2 sm:$0x1] }
 0x4e6   : > { %v1821_v4 = vmax.f32 %v1819_v2, %v1820_v3 }
 0x4e8   : > { %v1822_v5 = vpack.c.bf16 %v1821_v4, %v1821_v4 }
 0x4ea   : > { %2509 = vmatmul.mubr.bf16.vlgmr.msra.gmra.mrb[20].mxu0 %v1822_v5 }
 0x5bd   : > { %v1922_v15 = vpop.f32.mrb[20].mxu0 }
 0x5be   : > { %v1923_v16 = vadd.f32 %v1922_v15, %v1839_v14  ;;  %v2510_v17 = vpop.f32.mrb[21].mxu0 }
 0x5bf   : > { %v1925_v18 = vpop.f32.mrb[22].mxu0 }
 0x5c0   : > { %v1928_v19 = vsub.f32 0.0, %v1923_v16  ;;  %v2511_v20 = vpop.f32.mrb[23].mxu0 }
 0x5c2   : > { %v1929_v21 = vmul.f32 1.442695, %v1928_v19 }
 0x5c4   : > { %2689 = vpow2.f32 %v1929_v21 }
 0x5ce   : > { %v2690_v22 = vpop.eup %2689 }
 0x5cf   : > { %v1931_v23 = vadd.f32 1.0, %v2690_v22 }
 0x5d1   : > { %2691 = vrcp.f32 %v1931_v23 }
 0x5db   : > { %v2692_v24 = vpop.eup %2691 }
 0x5dc   : > { %v1933_v25 = vpack.c.bf16 %v2692_v24, %v2692_v24 }
 0x5de   : > { %2529 = vmatmul.mubr.bf16.vlgmr.msra.gmra.mrb[20].mxu1 %v1933_v25 }
 0x6b1   : > { %v2033_v29 = vpop.f32.mrb[20].mxu1 }
 0x6b2   : > { %v2034_v30 = vadd.f32 %v2033_v29, %v1950_v27  ;;  %v2530_v31 = vpop.f32.mrb[21].mxu1 }
 0x6b3   : > { %v2036_v32 = vpop.f32.mrb[22].mxu1 }
 0x6b4   : > { %v2531_v33 = vpop.f32.mrb[23].mxu1  ;;  %v2042_v34 = vsel %vm2041_vm1, %v2034_v30, -inf }
 0x6b5   : > { %v2044_v35 = vsel %vm2043_vm2, %v2042_v34, -inf }
 0x6b6   : > { %2045 = vmax.xlane.f32.xlu0 %v2044_v35 }
 0x743   : > { %v2046_v36 = vpop.xlane.xlu0 %2045 }
 0x744   : > { %v2047_v37 = vsub.f32 %v2042_v34, %v2046_v36 }
 0x746   : > { %v2048_v38 = vmul.f32 1.442695, %v2047_v37 }
 0x748   : > { %2693 = vpow2.f32 %v2048_v38 }
 0x752   : > { %v2694_v39 = vpop.eup %2693 }
 0x753   : > { %v2050_v40 = vsel %vm2043_vm2, %v2694_v39, 0.0 }
 0x754   : > { %2051 = vadd.xlane.f32.xlu0 %v2050_v40 }
 0x7e1   : > { %v2052_v41 = vpop.xlane.xlu0 %2051 }
 0x7e2   : > { %2695 = vlog2.f32 %v2052_v41 }
 0x7ec   : > { %v2696_v42 = vpop.eup %2695 }
 0x7ed   : > { %v2054_v43 = vmul.f32 0.6931472, %v2696_v42 }
 0x7ef   : > { %v2055_v44 = vsub.f32 %v2047_v37, %v2054_v43 }
 0x7f1   : > { %2056 = vst [vmem:[%s486_s27] sm:$0x1] %v2055_v44 }
 0x7f2   : > { %2710 = shalt.err (!%p2707_p3)
}
 0x7f3   : > { %s2711_s17 = scalar_lea.hbm %s3310_s29, 16  ;;  %s2715_s24 = scalar_lea.hbm %s3367_s15, 32 }
 0x7f4   : > { %p2712_p4 = scmp.ne.s32.totalorder %s3310_s29, %s2711_s17  ;;  %p2716_p9 = scmp.lt.u32.totalorder %s3310_s29, %s3367_s15 }
 0x7f5   : > { %p2717_p10 = scmp.lt.u32.totalorder %s2715_s24, %s2711_s17  ;;  %p2719_p12 = scmp.lt.u32.totalorder %s2711_s17, %s3310_s29 }
 0x7f6   : > { %p2713_p7 = pnand %p2712_p4, %p2882_p5 }
 0x7f7   : > { %p2718_p11 = por %p2717_p10, %p2716_p9 }
 0x7f8   : > { %p2714_p8 = pneg %p2713_p7 }
 0x7f9   : > { %p2720_p13 = por %p2719_p12, %p2718_p11 }
 0x7fb   : > { %p2721_p0 = pnand %p2720_p13, %p2714_p8 }
 0x7fd   : > { %2724 = shalt.err (!%p2721_p0)
}
 0x7fe   : > { %2532 = dma.vmem_to_hbm [thread:$0]  (%p2882_p5), %s3312_s25, 16, %s3310_s29, %s2058_s18  }
 0x7ff PF: > { %s3380_s26 = sld [smem:[#allocation7_spill]]  ;;  %p2538_p1 = scmp.ge.s32.totalorder %s2759_s21, 2 }
 0x801   : > { %p2535_p2 = pnand %p2538_p1, %p2886_p6 }
 0x805   : > { %s2082_s30 = sand.u32 1, %s3380_s26  }
 0x806   : > { %s2083_s23 = scalar_lea.sflag [#allocation5], %s2082_s30 }
 0x807   : > { %2742 = dma.done.wait (!%p2535_p2), %s2083_s23, 16  }
 0x808   : > { %2744 = vsyncadd (!%p2535_p2), %s2083_s23, 4294967280  ;;  %s3382_s21 = sld [smem:[#allocation9_spill]]  ;;  %s3383_s17 = sld [smem:[#allocation8_spill]] }
 0x809   : > { %s3384_s20 = sld [smem:[#allocation10_spill]]  ;;  %s3385_s18 = smov %s2751_s19 }
 0x80e   : > { %p25_p3 = scmp.ge.s32.totalorder %s3382_s21, 4   ;;  %s3386_s19 = smov %s3383_s17 }
 0x810   :  { %27 = sbr.rel (!%p25_p3) target bundleno = 3 (0x3), region = 122 }
 0x817   :  { %2087 = vsyncpa [#allocation5], 1 }
 0x818   :  { %2089 = vsyncpa [#allocation5 + $0x1], 1 }

</bundles_post_ra>
